<compile_context>
chip_gen: v7x
topology: tpu7x:2x2x1
jax: 0.10.0
libtpu: 0.0.40
codegen_flags: <defaults>
</compile_context>

<pallas_src>
import functools

import jax
import jax.numpy as jnp
from jax.experimental import pallas as pl
from jax.experimental.pallas import tpu as pltpu

BN_EPS = 1e-5

N_H1 = 512    # 500 padded to a lane multiple
N_H2 = 256
N_OUT = 128   # 10 padded to a lane multiple


def small_cnn_kernel(x_ref,
                     w1_ref, g1_ref, be1_ref,
                     w2_ref, g2_ref, be2_ref,
                     w3_ref, b3_ref,
                     o_ref,
                     s1a, s1b, s2a, s2b,
                     *, batch, tile_m):
    """3-phase fused MLP head. s*a/s*b hold (sum, sumsq), then (scale, shift)."""
    p = pl.program_id(0)   # phase
    i = pl.program_id(1)   # batch tile

    inv_b = 1.0 / batch

    # Rows beyond the real batch (padded up to a tile multiple) must not
    # contribute to the BN statistics.
    row = i * tile_m + jax.lax.broadcasted_iota(jnp.int32, (tile_m, 1), 0)
    valid = row < batch

    @pl.when((p == 0) & (i == 0))
    def _init():
        s1a[...] = jnp.zeros_like(s1a)
        s1b[...] = jnp.zeros_like(s1b)
        s2a[...] = jnp.zeros_like(s2a)
        s2b[...] = jnp.zeros_like(s2b)

    @pl.when((p == 1) & (i == 0))
    def _finalize_bn1():
        mean = s1a[...] * inv_b
        var = s1b[...] * inv_b - mean * mean
        scale = g1_ref[...] * jax.lax.rsqrt(var + BN_EPS)
        s1a[...] = scale
        s1b[...] = be1_ref[...] - mean * scale

    @pl.when((p == 2) & (i == 0))
    def _finalize_bn2():
        mean = s2a[...] * inv_b
        var = s2b[...] * inv_b - mean * mean
        scale = g2_ref[...] * jax.lax.rsqrt(var + BN_EPS)
        s2a[...] = scale
        s2b[...] = be2_ref[...] - mean * scale

    # Layer-1 matmul is needed in every phase; its bias is cancelled by BN.
    h1 = jnp.dot(x_ref[...], w1_ref[...], preferred_element_type=jnp.float32)

    @pl.when(p == 0)
    def _phase0():
        h1m = jnp.where(valid, h1, 0.0)
        s1a[...] += jnp.sum(h1m, axis=0, keepdims=True)
        s1b[...] += jnp.sum(h1m * h1m, axis=0, keepdims=True)
        o_ref[...] = jnp.zeros_like(o_ref)

    @pl.when(p == 1)
    def _phase1():
        h1n = jnp.maximum(h1 * s1a[...] + s1b[...], 0.0)
        h2 = jnp.dot(h1n.astype(jnp.bfloat16), w2_ref[...],
                     preferred_element_type=jnp.float32)
        h2m = jnp.where(valid, h2, 0.0)
        s2a[...] += jnp.sum(h2m, axis=0, keepdims=True)
        s2b[...] += jnp.sum(h2m * h2m, axis=0, keepdims=True)
        o_ref[...] = jnp.zeros_like(o_ref)

    @pl.when(p == 2)
    def _phase2():
        h1n = jnp.maximum(h1 * s1a[...] + s1b[...], 0.0)
        h2 = jnp.dot(h1n.astype(jnp.bfloat16), w2_ref[...],
                     preferred_element_type=jnp.float32)
        h2n = jnp.maximum(h2 * s2a[...] + s2b[...], 0.0)
        logits = jnp.dot(h2n.astype(jnp.bfloat16), w3_ref[...],
                         preferred_element_type=jnp.float32) + b3_ref[...]
        o_ref[...] = logits.astype(o_ref.dtype)


def _round_up(n, m):
    return ((n + m - 1) // m) * m


def small_cnn_forward(x, kernel_params):
    (w1, g1, be1, w2, g2, be2, w3, b3) = kernel_params
    B, n_z = x.shape

    # Batch tile: multiple of 8 (sublane), capped at 256 (v6e/v7x MXU M dim).
    tile_m = min(256, _round_up(B, 8))
    b_pad = _round_up(B, tile_m)
    n_tiles = b_pad // tile_m

    x_pad = x
    if b_pad != B:
        x_pad = jnp.pad(x, ((0, b_pad - B), (0, 0)))
    x_pad = x_pad.astype(jnp.bfloat16)

    def resident(arr):
        # Full-array block + constant index_map -> stays VMEM-resident
        # across all grid steps (no re-DMA).
        return pl.BlockSpec(arr.shape, lambda p, i: (0, 0))

    grid_spec = pltpu.PrefetchScalarGridSpec(
        num_scalar_prefetch=0,
        grid=(3, n_tiles),                                      # (phase, batch tile)
        in_specs=[
            pl.BlockSpec((tile_m, n_z), lambda p, i: (i, 0)),   # x
            resident(w1), resident(g1), resident(be1),
            resident(w2), resident(g2), resident(be2),
            resident(w3), resident(b3),
        ],
        out_specs=pl.BlockSpec((tile_m, N_OUT), lambda p, i: (i, 0)),
        scratch_shapes=[
            pltpu.VMEM((1, N_H1), jnp.float32),
            pltpu.VMEM((1, N_H1), jnp.float32),
            pltpu.VMEM((1, N_H2), jnp.float32),
            pltpu.VMEM((1, N_H2), jnp.float32),
        ],
    )

    flops = 2 * 3 * b_pad * (n_z * N_H1 + N_H1 * N_H2 + N_H2 * N_OUT)
    bytes_accessed = int(
        2 * (w1.size + w2.size + w3.size)                       # bf16 weights
        + 4 * (g1.size + be1.size + g2.size + be2.size + b3.size)
        + 3 * 2 * b_pad * n_z                                   # x once per phase
        + 3 * 4 * b_pad * N_OUT)                                # output writebacks

    out_pad = pl.pallas_call(
        functools.partial(small_cnn_kernel, batch=B, tile_m=tile_m),
        out_shape=jax.ShapeDtypeStruct((b_pad, N_OUT), jnp.float32),
        grid_spec=grid_spec,
        compiler_params=pltpu.CompilerParams(
            # Both axes "arbitrary": phase axis is a sequential reduction and
            # the batch axis accumulates BN stats into shared scratch.
            # TODO(synk): on v7x, shard the batch axis across the 2 TensorCores
            # with a cross-core (CMEM/barrier) stats reduction.
            dimension_semantics=("arbitrary", "arbitrary"),
            vmem_limit_bytes=32 * 1024 * 1024,
        ),
        cost_estimate=pl.CostEstimate(flops=flops, transcendentals=0,
                                      bytes_accessed=bytes_accessed),
    )(x_pad, w1, g1, be1, w2, g2, be2, w3, b3)

    return out_pad[:B, :10]


def init_params(key, n_z):
    # PyTorch-like Linear init (U[-1/sqrt(fan_in), 1/sqrt(fan_in)]), f32,
    # logical (unpadded) shapes. Biases b1/b2 are created for the reference but
    # dropped for the kernel (no-ops before training-mode BN).
    def linear_init(k, fan_in, fan_out):
        kw, kb = jax.random.split(k)
        bound = 1.0 / jnp.sqrt(fan_in)
        w = jax.random.uniform(kw, (fan_in, fan_out), jnp.float32, -bound, bound)
        b = jax.random.uniform(kb, (1, fan_out), jnp.float32, -bound, bound)
        return w, b

    k1, k2, k3 = jax.random.split(key, 3)
    w1, b1 = linear_init(k1, n_z, 500)
    w2, b2 = linear_init(k2, 500, 256)
    w3, b3 = linear_init(k3, 256, 10)
    g1, be1 = jnp.ones((1, 500), jnp.float32), jnp.zeros((1, 500), jnp.float32)
    g2, be2 = jnp.ones((1, 256), jnp.float32), jnp.zeros((1, 256), jnp.float32)
    return (w1, b1, g1, be1, w2, b2, g2, be2, w3, b3)


def _pad_to(a, shape, fill=0.0):
    pads = [(0, t - s) for s, t in zip(a.shape, shape)]
    return jnp.pad(a, pads, constant_values=fill)


def prepare_params(params):
    # Pad to lane-dense shapes, cast weights to bf16, drop cancelled biases.
    (w1, b1, g1, be1, w2, b2, g2, be2, w3, b3) = params
    del b1, b2  # bias before training-mode BN is cancelled by mean subtraction
    w1p = _pad_to(w1, (w1.shape[0], N_H1)).astype(jnp.bfloat16)
    g1p = _pad_to(g1, (1, N_H1), fill=1.0)
    be1p = _pad_to(be1, (1, N_H1))
    w2p = _pad_to(w2, (N_H1, N_H2)).astype(jnp.bfloat16)
    w3p = _pad_to(w3, (N_H2, N_OUT)).astype(jnp.bfloat16)
    b3p = _pad_to(b3, (1, N_OUT))
    return (w1p, g1p, be1p, w2p, g2, be2, w3p, b3p)


def reference_forward(x, params):
    # Pure-JAX f32 reference (training-mode BatchNorm1d, biased variance).
    (w1, b1, g1, be1, w2, b2, g2, be2, w3, b3) = params

    def bn_relu(h, g, be):
        mean = jnp.mean(h, axis=0, keepdims=True)
        var = jnp.mean((h - mean) ** 2, axis=0, keepdims=True)
        return jnp.maximum((h - mean) / jnp.sqrt(var + BN_EPS) * g + be, 0.0)

    h1 = bn_relu(x @ w1 + b1, g1, be1)
    h2 = bn_relu(h1 @ w2 + b2, g2, be2)
    return h2 @ w3 + b3


if __name__ == "__main__":
    key = jax.random.PRNGKey(0)
    kx, kp = jax.random.split(key)

    n_z = 32
    params = init_params(kp, n_z)
    kparams = prepare_params(params)

    # B=8: single-tile path; B=300: multi-tile path with batch padding + masks.
    for B in (8, 300):
        xb = jax.random.normal(jax.random.fold_in(kx, B), (B, n_z), jnp.float32)
        out = jax.block_until_ready(small_cnn_forward(xb, kparams))
        ref = reference_forward(xb, params)
        assert out.shape == (B, 10)
        # bf16 MXU inputs (f32 accumulation) vs pure-f32 reference -> loose tol.
        assert jnp.allclose(out, ref, atol=1e-1, rtol=1e-1), f"mismatch at B={B}"

    print("KERNEL_OK")
</pallas_src>

<mosaic_0001>
module attributes {stable_mosaic.version = 11 : i64} {
  func.func @small_cnn_kernel(%arg0: i32, %arg1: i32, %arg2: memref<8x32xbf16, #tpu.memory_space<vmem>>, %arg3: memref<32x512xbf16, #tpu.memory_space<vmem>>, %arg4: memref<1x512xf32, #tpu.memory_space<vmem>>, %arg5: memref<1x512xf32, #tpu.memory_space<vmem>>, %arg6: memref<512x256xbf16, #tpu.memory_space<vmem>>, %arg7: memref<1x256xf32, #tpu.memory_space<vmem>>, %arg8: memref<1x256xf32, #tpu.memory_space<vmem>>, %arg9: memref<256x128xbf16, #tpu.memory_space<vmem>>, %arg10: memref<1x128xf32, #tpu.memory_space<vmem>>, %arg11: memref<8x128xf32, #tpu.memory_space<vmem>>, %arg12: memref<1x512xf32, #tpu.memory_space<vmem>>, %arg13: memref<1x512xf32, #tpu.memory_space<vmem>>, %arg14: memref<1x256xf32, #tpu.memory_space<vmem>>, %arg15: memref<1x256xf32, #tpu.memory_space<vmem>>) attributes {dimension_semantics = [#tpu.dimension_semantics<arbitrary>, #tpu.dimension_semantics<arbitrary>], iteration_bounds = array<i64: 3, 1>, scalar_prefetch = 0 : i64, scratch_operands = 4 : i64, tpu.core_type = #tpu.core_type<tc>, window_params = [{transform_indices = @transform_0, window_bounds = array<i64: 8, 32>}, {pipeline_mode = #tpu.pipeline_mode<synchronous>, transform_indices = @transform_1, window_bounds = array<i64: 32, 512>}, {pipeline_mode = #tpu.pipeline_mode<synchronous>, transform_indices = @transform_2, window_bounds = array<i64: 1, 512>}, {pipeline_mode = #tpu.pipeline_mode<synchronous>, transform_indices = @transform_3, window_bounds = array<i64: 1, 512>}, {pipeline_mode = #tpu.pipeline_mode<synchronous>, transform_indices = @transform_4, window_bounds = array<i64: 512, 256>}, {pipeline_mode = #tpu.pipeline_mode<synchronous>, transform_indices = @transform_5, window_bounds = array<i64: 1, 256>}, {pipeline_mode = #tpu.pipeline_mode<synchronous>, transform_indices = @transform_6, window_bounds = array<i64: 1, 256>}, {pipeline_mode = #tpu.pipeline_mode<synchronous>, transform_indices = @transform_7, window_bounds = array<i64: 256, 128>}, {pipeline_mode = #tpu.pipeline_mode<synchronous>, transform_indices = @transform_8, window_bounds = array<i64: 1, 128>}, {transform_indices = @transform_9, window_bounds = array<i64: 8, 128>}]} {
    %c8_i32 = arith.constant 8 : i32
    %0 = arith.muli %arg1, %c8_i32 : i32
    %1 = tpu.iota {dimensions = array<i32: 0>} : vector<8x1xi32>
    %2 = vector.broadcast %0 : i32 to vector<8x1xi32>
    %3 = arith.addi %2, %1 : vector<8x1xi32>
    %c8_i32_0 = arith.constant 8 : i32
    %4 = vector.broadcast %c8_i32_0 : i32 to vector<8x1xi32>
    %5 = arith.cmpi slt, %3, %4 : vector<8x1xi32>
    %c0_i32 = arith.constant 0 : i32
    %6 = arith.cmpi eq, %arg0, %c0_i32 : i32
    %c0_i32_1 = arith.constant 0 : i32
    %7 = arith.cmpi eq, %arg1, %c0_i32_1 : i32
    %8 = arith.andi %6, %7 : i1
    %9 = arith.extui %8 : i1 to i32
    %c0_i32_2 = arith.constant 0 : i32
    %10 = arith.cmpi ne, %9, %c0_i32_2 : i32
    scf.if %10 {
      %cst_16 = arith.constant 0.000000e+00 : f32
      %33 = vector.broadcast %cst_16 : f32 to vector<1x512xf32>
      %c0_17 = arith.constant 0 : index
      %c0_18 = arith.constant 0 : index
      %34 = vector.load %arg12[%c0_17, %c0_18] : memref<1x512xf32, #tpu.memory_space<vmem>>, vector<1x512xf32>
      tpu.vector_store %arg12[%c0_17, %c0_18], %33 {strides = array<i32>} : memref<1x512xf32, #tpu.memory_space<vmem>>, vector<1x512xf32>,
      %cst_19 = arith.constant 0.000000e+00 : f32
      %35 = vector.broadcast %cst_19 : f32 to vector<1x512xf32>
      %c0_20 = arith.constant 0 : index
      %c0_21 = arith.constant 0 : index
      %36 = vector.load %arg13[%c0_20, %c0_21] : memref<1x512xf32, #tpu.memory_space<vmem>>, vector<1x512xf32>
      tpu.vector_store %arg13[%c0_20, %c0_21], %35 {strides = array<i32>} : memref<1x512xf32, #tpu.memory_space<vmem>>, vector<1x512xf32>,
      %cst_22 = arith.constant 0.000000e+00 : f32
      %37 = vector.broadcast %cst_22 : f32 to vector<1x256xf32>
      %c0_23 = arith.constant 0 : index
      %c0_24 = arith.constant 0 : index
      %38 = vector.load %arg14[%c0_23, %c0_24] : memref<1x256xf32, #tpu.memory_space<vmem>>, vector<1x256xf32>
      tpu.vector_store %arg14[%c0_23, %c0_24], %37 {strides = array<i32>} : memref<1x256xf32, #tpu.memory_space<vmem>>, vector<1x256xf32>,
      %cst_25 = arith.constant 0.000000e+00 : f32
      %39 = vector.broadcast %cst_25 : f32 to vector<1x256xf32>
      %c0_26 = arith.constant 0 : index
      %c0_27 = arith.constant 0 : index
      %40 = vector.load %arg15[%c0_26, %c0_27] : memref<1x256xf32, #tpu.memory_space<vmem>>, vector<1x256xf32>
      tpu.vector_store %arg15[%c0_26, %c0_27], %39 {strides = array<i32>} : memref<1x256xf32, #tpu.memory_space<vmem>>, vector<1x256xf32>,
    } else {
    }
    %c1_i32 = arith.constant 1 : i32
    %11 = arith.cmpi eq, %arg0, %c1_i32 : i32
    %c0_i32_3 = arith.constant 0 : i32
    %12 = arith.cmpi eq, %arg1, %c0_i32_3 : i32
    %13 = arith.andi %11, %12 : i1
    %14 = arith.extui %13 : i1 to i32
    %c0_i32_4 = arith.constant 0 : i32
    %15 = arith.cmpi ne, %14, %c0_i32_4 : i32
    scf.if %15 {
      %c0_16 = arith.constant 0 : index
      %c0_17 = arith.constant 0 : index
      %33 = vector.load %arg12[%c0_16, %c0_17] : memref<1x512xf32, #tpu.memory_space<vmem>>, vector<1x512xf32>
      %cst_18 = arith.constant 1.250000e-01 : f32
      %34 = vector.broadcast %cst_18 : f32 to vector<1x512xf32>
      %35 = arith.mulf %33, %34 : vector<1x512xf32>
      %c0_19 = arith.constant 0 : index
      %c0_20 = arith.constant 0 : index
      %36 = vector.load %arg13[%c0_19, %c0_20] : memref<1x512xf32, #tpu.memory_space<vmem>>, vector<1x512xf32>
      %cst_21 = arith.constant 1.250000e-01 : f32
      %37 = vector.broadcast %cst_21 : f32 to vector<1x512xf32>
      %38 = arith.mulf %36, %37 : vector<1x512xf32>
      %39 = arith.mulf %35, %35 : vector<1x512xf32>
      %40 = arith.subf %38, %39 : vector<1x512xf32>
      %c0_22 = arith.constant 0 : index
      %c0_23 = arith.constant 0 : index
      %41 = vector.load %arg4[%c0_22, %c0_23] : memref<1x512xf32, #tpu.memory_space<vmem>>, vector<1x512xf32>
      %cst_24 = arith.constant 9.99999974E-6 : f32
      %42 = vector.broadcast %cst_24 : f32 to vector<1x512xf32>
      %43 = arith.addf %40, %42 : vector<1x512xf32>
      %44 = math.rsqrt %43 : vector<1x512xf32>
      %45 = arith.mulf %41, %44 : vector<1x512xf32>
      %c0_25 = arith.constant 0 : index
      %c0_26 = arith.constant 0 : index
      %46 = vector.load %arg12[%c0_25, %c0_26] : memref<1x512xf32, #tpu.memory_space<vmem>>, vector<1x512xf32>
      tpu.vector_store %arg12[%c0_25, %c0_26], %45 {strides = array<i32>} : memref<1x512xf32, #tpu.memory_space<vmem>>, vector<1x512xf32>,
      %c0_27 = arith.constant 0 : index
      %c0_28 = arith.constant 0 : index
      %47 = vector.load %arg5[%c0_27, %c0_28] : memref<1x512xf32, #tpu.memory_space<vmem>>, vector<1x512xf32>
      %48 = arith.mulf %35, %45 : vector<1x512xf32>
      %49 = arith.subf %47, %48 : vector<1x512xf32>
      %c0_29 = arith.constant 0 : index
      %c0_30 = arith.constant 0 : index
      %50 = vector.load %arg13[%c0_29, %c0_30] : memref<1x512xf32, #tpu.memory_space<vmem>>, vector<1x512xf32>
      tpu.vector_store %arg13[%c0_29, %c0_30], %49 {strides = array<i32>} : memref<1x512xf32, #tpu.memory_space<vmem>>, vector<1x512xf32>,
    } else {
    }
    %c2_i32 = arith.constant 2 : i32
    %16 = arith.cmpi eq, %arg0, %c2_i32 : i32
    %c0_i32_5 = arith.constant 0 : i32
    %17 = arith.cmpi eq, %arg1, %c0_i32_5 : i32
    %18 = arith.andi %16, %17 : i1
    %19 = arith.extui %18 : i1 to i32
    %c0_i32_6 = arith.constant 0 : i32
    %20 = arith.cmpi ne, %19, %c0_i32_6 : i32
    scf.if %20 {
      %c0_16 = arith.constant 0 : index
      %c0_17 = arith.constant 0 : index
      %33 = vector.load %arg14[%c0_16, %c0_17] : memref<1x256xf32, #tpu.memory_space<vmem>>, vector<1x256xf32>
      %cst_18 = arith.constant 1.250000e-01 : f32
      %34 = vector.broadcast %cst_18 : f32 to vector<1x256xf32>
      %35 = arith.mulf %33, %34 : vector<1x256xf32>
      %c0_19 = arith.constant 0 : index
      %c0_20 = arith.constant 0 : index
      %36 = vector.load %arg15[%c0_19, %c0_20] : memref<1x256xf32, #tpu.memory_space<vmem>>, vector<1x256xf32>
      %cst_21 = arith.constant 1.250000e-01 : f32
      %37 = vector.broadcast %cst_21 : f32 to vector<1x256xf32>
      %38 = arith.mulf %36, %37 : vector<1x256xf32>
      %39 = arith.mulf %35, %35 : vector<1x256xf32>
      %40 = arith.subf %38, %39 : vector<1x256xf32>
      %c0_22 = arith.constant 0 : index
      %c0_23 = arith.constant 0 : index
      %41 = vector.load %arg7[%c0_22, %c0_23] : memref<1x256xf32, #tpu.memory_space<vmem>>, vector<1x256xf32>
      %cst_24 = arith.constant 9.99999974E-6 : f32
      %42 = vector.broadcast %cst_24 : f32 to vector<1x256xf32>
      %43 = arith.addf %40, %42 : vector<1x256xf32>
      %44 = math.rsqrt %43 : vector<1x256xf32>
      %45 = arith.mulf %41, %44 : vector<1x256xf32>
      %c0_25 = arith.constant 0 : index
      %c0_26 = arith.constant 0 : index
      %46 = vector.load %arg14[%c0_25, %c0_26] : memref<1x256xf32, #tpu.memory_space<vmem>>, vector<1x256xf32>
      tpu.vector_store %arg14[%c0_25, %c0_26], %45 {strides = array<i32>} : memref<1x256xf32, #tpu.memory_space<vmem>>, vector<1x256xf32>,
      %c0_27 = arith.constant 0 : index
      %c0_28 = arith.constant 0 : index
      %47 = vector.load %arg8[%c0_27, %c0_28] : memref<1x256xf32, #tpu.memory_space<vmem>>, vector<1x256xf32>
      %48 = arith.mulf %35, %45 : vector<1x256xf32>
      %49 = arith.subf %47, %48 : vector<1x256xf32>
      %c0_29 = arith.constant 0 : index
      %c0_30 = arith.constant 0 : index
      %50 = vector.load %arg15[%c0_29, %c0_30] : memref<1x256xf32, #tpu.memory_space<vmem>>, vector<1x256xf32>
      tpu.vector_store %arg15[%c0_29, %c0_30], %49 {strides = array<i32>} : memref<1x256xf32, #tpu.memory_space<vmem>>, vector<1x256xf32>,
    } else {
    }
    %c0 = arith.constant 0 : index
    %c0_7 = arith.constant 0 : index
    %21 = vector.load %arg2[%c0, %c0_7] : memref<8x32xbf16, #tpu.memory_space<vmem>>, vector<8x32xbf16>
    %c0_8 = arith.constant 0 : index
    %c0_9 = arith.constant 0 : index
    %22 = vector.load %arg3[%c0_8, %c0_9] : memref<32x512xbf16, #tpu.memory_space<vmem>>, vector<32x512xbf16>
    %cst = arith.constant dense<0.000000e+00> : vector<8x512xf32>
    %23 = tpu.matmul %21, %22, %cst {dimension_numbers = #tpu.dot_dimension_numbers<[1], [0], [0], [1], [0, 0, 1, 1], [], []>} : vector<8x32xbf16>, vector<32x512xbf16>, vector<8x512xf32> -> vector<8x512xf32>
    %c0_i32_10 = arith.constant 0 : i32
    %24 = arith.cmpi eq, %arg0, %c0_i32_10 : i32
    %25 = arith.extui %24 : i1 to i32
    %c0_i32_11 = arith.constant 0 : i32
    %26 = arith.cmpi ne, %25, %c0_i32_11 : i32
    scf.if %26 {
      %cst_16 = arith.constant 0.000000e+00 : f32
      %33 = vector.shape_cast %5 : vector<8x1xi1> to vector<8x1xi1>
      %34 = vector.broadcast %33 : vector<8x1xi1> to vector<8x512xi1>
      %35 = vector.broadcast %cst_16 : f32 to vector<8x512xf32>
      %36 = arith.select %34, %23, %35 : vector<8x512xi1>, vector<8x512xf32>
      %c0_17 = arith.constant 0 : index
      %c0_18 = arith.constant 0 : index
      %37 = vector.load %arg12[%c0_17, %c0_18] : memref<1x512xf32, #tpu.memory_space<vmem>>, vector<1x512xf32>
      %cst_19 = arith.constant dense<0.000000e+00> : vector<512xf32>
      %38 = vector.multi_reduction <add>, %36, %cst_19 [0] : vector<8x512xf32> to vector<512xf32>
      %39 = vector.shape_cast %38 : vector<512xf32> to vector<1x512xf32>
      %40 = arith.addf %37, %39 : vector<1x512xf32>
      %c0_20 = arith.constant 0 : index
      %c0_21 = arith.constant 0 : index
      %41 = vector.load %arg12[%c0_20, %c0_21] : memref<1x512xf32, #tpu.memory_space<vmem>>, vector<1x512xf32>
      tpu.vector_store %arg12[%c0_20, %c0_21], %40 {strides = array<i32>} : memref<1x512xf32, #tpu.memory_space<vmem>>, vector<1x512xf32>,
      %c0_22 = arith.constant 0 : index
      %c0_23 = arith.constant 0 : index
      %42 = vector.load %arg13[%c0_22, %c0_23] : memref<1x512xf32, #tpu.memory_space<vmem>>, vector<1x512xf32>
      %43 = arith.mulf %36, %36 : vector<8x512xf32>
      %cst_24 = arith.constant dense<0.000000e+00> : vector<512xf32>
      %44 = vector.multi_reduction <add>, %43, %cst_24 [0] : vector<8x512xf32> to vector<512xf32>
      %45 = vector.shape_cast %44 : vector<512xf32> to vector<1x512xf32>
      %46 = arith.addf %42, %45 : vector<1x512xf32>
      %c0_25 = arith.constant 0 : index
      %c0_26 = arith.constant 0 : index
      %47 = vector.load %arg13[%c0_25, %c0_26] : memref<1x512xf32, #tpu.memory_space<vmem>>, vector<1x512xf32>
      tpu.vector_store %arg13[%c0_25, %c0_26], %46 {strides = array<i32>} : memref<1x512xf32, #tpu.memory_space<vmem>>, vector<1x512xf32>,
      %cst_27 = arith.constant 0.000000e+00 : f32
      %48 = vector.broadcast %cst_27 : f32 to vector<8x128xf32>
      %c0_28 = arith.constant 0 : index
      %c0_29 = arith.constant 0 : index
      %49 = vector.load %arg11[%c0_28, %c0_29] : memref<8x128xf32, #tpu.memory_space<vmem>>, vector<8x128xf32>
      tpu.vector_store %arg11[%c0_28, %c0_29], %48 {strides = array<i32>} : memref<8x128xf32, #tpu.memory_space<vmem>>, vector<8x128xf32>,
    } else {
    }
    %c1_i32_12 = arith.constant 1 : i32
    %27 = arith.cmpi eq, %arg0, %c1_i32_12 : i32
    %28 = arith.extui %27 : i1 to i32
    %c0_i32_13 = arith.constant 0 : i32
    %29 = arith.cmpi ne, %28, %c0_i32_13 : i32
    scf.if %29 {
      %c0_16 = arith.constant 0 : index
      %c0_17 = arith.constant 0 : index
      %33 = vector.load %arg12[%c0_16, %c0_17] : memref<1x512xf32, #tpu.memory_space<vmem>>, vector<1x512xf32>
      %34 = vector.broadcast %33 : vector<1x512xf32> to vector<8x512xf32>
      %35 = arith.mulf %23, %34 : vector<8x512xf32>
      %c0_18 = arith.constant 0 : index
      %c0_19 = arith.constant 0 : index
      %36 = vector.load %arg13[%c0_18, %c0_19] : memref<1x512xf32, #tpu.memory_space<vmem>>, vector<1x512xf32>
      %37 = vector.broadcast %36 : vector<1x512xf32> to vector<8x512xf32>
      %38 = arith.addf %35, %37 : vector<8x512xf32>
      %cst_20 = arith.constant 0.000000e+00 : f32
      %39 = vector.broadcast %cst_20 : f32 to vector<8x512xf32>
      %40 = arith.maximumf %38, %39 : vector<8x512xf32>
      %41 = arith.truncf %40 : vector<8x512xf32> to vector<8x512xbf16>
      %c0_21 = arith.constant 0 : index
      %c0_22 = arith.constant 0 : index
      %42 = vector.load %arg6[%c0_21, %c0_22] : memref<512x256xbf16, #tpu.memory_space<vmem>>, vector<512x256xbf16>
      %cst_23 = arith.constant dense<0.000000e+00> : vector<8x256xf32>
      %43 = tpu.matmul %41, %42, %cst_23 {dimension_numbers = #tpu.dot_dimension_numbers<[1], [0], [0], [1], [0, 0, 1, 1], [], []>} : vector<8x512xbf16>, vector<512x256xbf16>, vector<8x256xf32> -> vector<8x256xf32>
      %cst_24 = arith.constant 0.000000e+00 : f32
      %44 = vector.shape_cast %5 : vector<8x1xi1> to vector<8x1xi1>
      %45 = vector.broadcast %44 : vector<8x1xi1> to vector<8x256xi1>
      %46 = vector.broadcast %cst_24 : f32 to vector<8x256xf32>
      %47 = arith.select %45, %43, %46 : vector<8x256xi1>, vector<8x256xf32>
      %c0_25 = arith.constant 0 : index
      %c0_26 = arith.constant 0 : index
      %48 = vector.load %arg14[%c0_25, %c0_26] : memref<1x256xf32, #tpu.memory_space<vmem>>, vector<1x256xf32>
      %cst_27 = arith.constant dense<0.000000e+00> : vector<256xf32>
      %49 = vector.multi_reduction <add>, %47, %cst_27 [0] : vector<8x256xf32> to vector<256xf32>
      %50 = vector.shape_cast %49 : vector<256xf32> to vector<1x256xf32>
      %51 = arith.addf %48, %50 : vector<1x256xf32>
      %c0_28 = arith.constant 0 : index
      %c0_29 = arith.constant 0 : index
      %52 = vector.load %arg14[%c0_28, %c0_29] : memref<1x256xf32, #tpu.memory_space<vmem>>, vector<1x256xf32>
      tpu.vector_store %arg14[%c0_28, %c0_29], %51 {strides = array<i32>} : memref<1x256xf32, #tpu.memory_space<vmem>>, vector<1x256xf32>,
      %c0_30 = arith.constant 0 : index
      %c0_31 = arith.constant 0 : index
      %53 = vector.load %arg15[%c0_30, %c0_31] : memref<1x256xf32, #tpu.memory_space<vmem>>, vector<1x256xf32>
      %54 = arith.mulf %47, %47 : vector<8x256xf32>
      %cst_32 = arith.constant dense<0.000000e+00> : vector<256xf32>
      %55 = vector.multi_reduction <add>, %54, %cst_32 [0] : vector<8x256xf32> to vector<256xf32>
      %56 = vector.shape_cast %55 : vector<256xf32> to vector<1x256xf32>
      %57 = arith.addf %53, %56 : vector<1x256xf32>
      %c0_33 = arith.constant 0 : index
      %c0_34 = arith.constant 0 : index
      %58 = vector.load %arg15[%c0_33, %c0_34] : memref<1x256xf32, #tpu.memory_space<vmem>>, vector<1x256xf32>
      tpu.vector_store %arg15[%c0_33, %c0_34], %57 {strides = array<i32>} : memref<1x256xf32, #tpu.memory_space<vmem>>, vector<1x256xf32>,
      %cst_35 = arith.constant 0.000000e+00 : f32
      %59 = vector.broadcast %cst_35 : f32 to vector<8x128xf32>
      %c0_36 = arith.constant 0 : index
      %c0_37 = arith.constant 0 : index
      %60 = vector.load %arg11[%c0_36, %c0_37] : memref<8x128xf32, #tpu.memory_space<vmem>>, vector<8x128xf32>
      tpu.vector_store %arg11[%c0_36, %c0_37], %59 {strides = array<i32>} : memref<8x128xf32, #tpu.memory_space<vmem>>, vector<8x128xf32>,
    } else {
    }
    %c2_i32_14 = arith.constant 2 : i32
    %30 = arith.cmpi eq, %arg0, %c2_i32_14 : i32
    %31 = arith.extui %30 : i1 to i32
    %c0_i32_15 = arith.constant 0 : i32
    %32 = arith.cmpi ne, %31, %c0_i32_15 : i32
    scf.if %32 {
      %c0_16 = arith.constant 0 : index
      %c0_17 = arith.constant 0 : index
      %33 = vector.load %arg12[%c0_16, %c0_17] : memref<1x512xf32, #tpu.memory_space<vmem>>, vector<1x512xf32>
      %34 = vector.broadcast %33 : vector<1x512xf32> to vector<8x512xf32>
      %35 = arith.mulf %23, %34 : vector<8x512xf32>
      %c0_18 = arith.constant 0 : index
      %c0_19 = arith.constant 0 : index
      %36 = vector.load %arg13[%c0_18, %c0_19] : memref<1x512xf32, #tpu.memory_space<vmem>>, vector<1x512xf32>
      %37 = vector.broadcast %36 : vector<1x512xf32> to vector<8x512xf32>
      %38 = arith.addf %35, %37 : vector<8x512xf32>
      %cst_20 = arith.constant 0.000000e+00 : f32
      %39 = vector.broadcast %cst_20 : f32 to vector<8x512xf32>
      %40 = arith.maximumf %38, %39 : vector<8x512xf32>
      %41 = arith.truncf %40 : vector<8x512xf32> to vector<8x512xbf16>
      %c0_21 = arith.constant 0 : index
      %c0_22 = arith.constant 0 : index
      %42 = vector.load %arg6[%c0_21, %c0_22] : memref<512x256xbf16, #tpu.memory_space<vmem>>, vector<512x256xbf16>
      %cst_23 = arith.constant dense<0.000000e+00> : vector<8x256xf32>
      %43 = tpu.matmul %41, %42, %cst_23 {dimension_numbers = #tpu.dot_dimension_numbers<[1], [0], [0], [1], [0, 0, 1, 1], [], []>} : vector<8x512xbf16>, vector<512x256xbf16>, vector<8x256xf32> -> vector<8x256xf32>
      %c0_24 = arith.constant 0 : index
      %c0_25 = arith.constant 0 : index
      %44 = vector.load %arg14[%c0_24, %c0_25] : memref<1x256xf32, #tpu.memory_space<vmem>>, vector<1x256xf32>
      %45 = vector.broadcast %44 : vector<1x256xf32> to vector<8x256xf32>
      %46 = arith.mulf %43, %45 : vector<8x256xf32>
      %c0_26 = arith.constant 0 : index
      %c0_27 = arith.constant 0 : index
      %47 = vector.load %arg15[%c0_26, %c0_27] : memref<1x256xf32, #tpu.memory_space<vmem>>, vector<1x256xf32>
      %48 = vector.broadcast %47 : vector<1x256xf32> to vector<8x256xf32>
      %49 = arith.addf %46, %48 : vector<8x256xf32>
      %cst_28 = arith.constant 0.000000e+00 : f32
      %50 = vector.broadcast %cst_28 : f32 to vector<8x256xf32>
      %51 = arith.maximumf %49, %50 : vector<8x256xf32>
      %52 = arith.truncf %51 : vector<8x256xf32> to vector<8x256xbf16>
      %c0_29 = arith.constant 0 : index
      %c0_30 = arith.constant 0 : index
      %53 = vector.load %arg9[%c0_29, %c0_30] : memref<256x128xbf16, #tpu.memory_space<vmem>>, vector<256x128xbf16>
      %cst_31 = arith.constant dense<0.000000e+00> : vector<8x128xf32>
      %54 = tpu.matmul %52, %53, %cst_31 {dimension_numbers = #tpu.dot_dimension_numbers<[1], [0], [0], [1], [0, 0, 1, 1], [], []>} : vector<8x256xbf16>, vector<256x128xbf16>, vector<8x128xf32> -> vector<8x128xf32>
      %c0_32 = arith.constant 0 : index
      %c0_33 = arith.constant 0 : index
      %55 = vector.load %arg10[%c0_32, %c0_33] : memref<1x128xf32, #tpu.memory_space<vmem>>, vector<1x128xf32>
      %56 = vector.broadcast %55 : vector<1x128xf32> to vector<8x128xf32>
      %57 = arith.addf %54, %56 : vector<8x128xf32>
      %c0_34 = arith.constant 0 : index
      %c0_35 = arith.constant 0 : index
      %58 = vector.load %arg11[%c0_34, %c0_35] : memref<8x128xf32, #tpu.memory_space<vmem>>, vector<8x128xf32>
      tpu.vector_store %arg11[%c0_34, %c0_35], %57 {strides = array<i32>} : memref<8x128xf32, #tpu.memory_space<vmem>>, vector<8x128xf32>,
    } else {
    }
    return
  }
  func.func @transform_0(%arg0: i32, %arg1: i32) -> (i32, i32) {
    %c0_i32 = arith.constant 0 : i32
    %c0_i32_0 = arith.constant 0 : i32
    return %arg1, %c0_i32 : i32, i32
  }
  func.func @transform_1(%arg0: i32, %arg1: i32) -> (i32, i32) {
    %c0_i32 = arith.constant 0 : i32
    %c0_i32_0 = arith.constant 0 : i32
    %c0_i32_1 = arith.constant 0 : i32
    return %c0_i32, %c0_i32_0 : i32, i32
  }
  func.func @transform_2(%arg0: i32, %arg1: i32) -> (i32, i32) {
    %c0_i32 = arith.constant 0 : i32
    %c0_i32_0 = arith.constant 0 : i32
    %c0_i32_1 = arith.constant 0 : i32
    return %c0_i32, %c0_i32_0 : i32, i32
  }
  func.func @transform_3(%arg0: i32, %arg1: i32) -> (i32, i32) {
    %c0_i32 = arith.constant 0 : i32
    %c0_i32_0 = arith.constant 0 : i32
    %c0_i32_1 = arith.constant 0 : i32
    return %c0_i32, %c0_i32_0 : i32, i32
  }
  func.func @transform_4(%arg0: i32, %arg1: i32) -> (i32, i32) {
    %c0_i32 = arith.constant 0 : i32
    %c0_i32_0 = arith.constant 0 : i32
    %c0_i32_1 = arith.constant 0 : i32
    return %c0_i32, %c0_i32_0 : i32, i32
  }
  func.func @transform_5(%arg0: i32, %arg1: i32) -> (i32, i32) {
    %c0_i32 = arith.constant 0 : i32
    %c0_i32_0 = arith.constant 0 : i32
    %c0_i32_1 = arith.constant 0 : i32
    return %c0_i32, %c0_i32_0 : i32, i32
  }
  func.func @transform_6(%arg0: i32, %arg1: i32) -> (i32, i32) {
    %c0_i32 = arith.constant 0 : i32
    %c0_i32_0 = arith.constant 0 : i32
    %c0_i32_1 = arith.constant 0 : i32
    return %c0_i32, %c0_i32_0 : i32, i32
  }
  func.func @transform_7(%arg0: i32, %arg1: i32) -> (i32, i32) {
    %c0_i32 = arith.constant 0 : i32
    %c0_i32_0 = arith.constant 0 : i32
    %c0_i32_1 = arith.constant 0 : i32
    return %c0_i32, %c0_i32_0 : i32, i32
  }
  func.func @transform_8(%arg0: i32, %arg1: i32) -> (i32, i32) {
    %c0_i32 = arith.constant 0 : i32
    %c0_i32_0 = arith.constant 0 : i32
    %c0_i32_1 = arith.constant 0 : i32
    return %c0_i32, %c0_i32_0 : i32, i32
  }
  func.func @transform_9(%arg0: i32, %arg1: i32) -> (i32, i32) {
    %c0_i32 = arith.constant 0 : i32
    %c0_i32_0 = arith.constant 0 : i32
    return %arg1, %c0_i32 : i32, i32
  }
}

</mosaic_0001>

<bundles_post_ra>
// kernel: tpu_custom_call.1
= control target key start
LH: loop header
LB: loop body
LE: loop exit
PB: predicated region body
PF: predicated region fallthrough
CT: control target
= control target key end

     0   :  { %14 = vsyncpa [#allocation7], 0  ;;  %s3164_s0 = inlined_call_operand.hbm [shape: bf16[8,32], index: 0, kind: input, shape index: {}]   ;;  %s3165_s1 = inlined_call_operand.hbm [shape: bf16[32,512], index: 1, kind: input, shape index: {}]   ;;  %s3166_s2 = inlined_call_operand.vmem [shape: f32[1,512], index: 2, kind: input, shape index: {}]   ;;  %s3167_s3 = inlined_call_operand.vmem [shape: f32[1,512], index: 3, kind: input, shape index: {}]   ;;  %s3168_s4 = inlined_call_operand.hbm [shape: bf16[512,256], index: 4, kind: input, shape index: {}]   ;;  %s3169_s5 = inlined_call_operand.vmem [shape: f32[1,256], index: 5, kind: input, shape index: {}]   ;;  %s3170_s6 = inlined_call_operand.vmem [shape: f32[1,256], index: 6, kind: input, shape index: {}]   ;;  %s3171_s7 = inlined_call_operand.hbm [shape: bf16[256,128], index: 7, kind: input, shape index: {}]   ;;  %s3172_s8 = inlined_call_operand.vmem [shape: f32[1,128], index: 8, kind: input, shape index: {}]   ;;  %s3173_s9 = inlined_call_operand.hbm [shape: f32[8,128], index: 9, kind: output, shape index: {}]  }
   0x1   :  { %15 = vsyncpa [#allocation10], 0 }
   0x2   :  { %16 = vsyncpa [#allocation13], 0 }
   0x3   :  { %17 = vsyncpa [#allocation8], 0  ;;  %s2907_s30 = smov 0   ;;  %s2909_s10 = smov 0  }
   0x4   :  { %s2911_s11 = smov 0  }
   0x5 LB: > { %3179 = sst [smem:[#allocation19_spill]] %s2834_s10  ;;  %s2840_s12 = smov [#allocation9]   ;;  %s2838_s11 = sphi %s2911_s11, %s23_s11   ;;  %s2834_s10 = sphi %s2909_s10, %s3190_s10   ;;  %s2830_s30 = sphi %s2907_s30, %s3189_s30  }
   0x6   : > { %s285_s13 = sshll.u32 %s2840_s12, 4  ;;  %s3176_s14 = sadd.s32 4294967295, %s2838_s11   ;;  %s2931_s13 = int_to_ptr.vmem [resolvable:$true] %s285_s13 }
   0x7   : > { %p2150_p0 = scmp.ge.s32.totalorder %s2838_s11, 1  ;;  %p260_p1 = scmp.lt.s32.totalorder %s2838_s11, 4 }
   0x8   : > { %p2927_p2 = scmp.eq.s32.totalorder %s3176_s14, 0  ;;  %s35_s18 = sadd.s32 1, %s2834_s10 }
   0x9   : > { %p2933_p3 = pnand %p2150_p0, %p260_p1  ;;  %p2946_p6 = scmp.ge.s32.totalorder %s35_s18, 3 }
   0xa   : > { %s3180_s15 = scalar_select %p2927_p2, 1, 0 }
   0xb   : > { %s3181_s16 = scalar_select %p2933_p3, 1, 0 }
   0xc   : > { %p2374_p4 = pneg %p2933_p3  ;;  %s2841_s20 = smov [#allocation6]  }
   0xd   : > { %s275_s21 = sshll.u32 %s2841_s20, 4  ;;  %s2662_s24 = scalar_lea.hbm %s3165_s1, 1024  ;;  %s276_s21 = int_to_ptr.vmem [resolvable:$true] %s275_s21 }
   0xe   : > { %p2941_p5 = pnand %p2927_p2, %p2374_p4  ;;  %p2663_p7 = scmp.ne.s32.totalorder %s3165_s1, %s2662_s24 }
   0xf   : > { %p2669_p11 = scmp.lt.u32.totalorder %s2662_s24, %s3165_s1 }
  0x10   : > { %p2958_p8 = pneg %p2941_p5 }
  0x12   : > { %p2665_p9 = pnand %p2958_p8, %p2663_p7 }
  0x14   : > { %p2666_p10 = pneg %p2665_p9 }
  0x16   : > { %p2671_p12 = pnand %p2669_p11, %p2666_p10 }
  0x18   : > { %2674 = shalt.err (!%p2671_p12)
}
  0x19   : > { %s2675_s12 = scalar_lea.vmem %s2931_s13, 1024  ;;  %p2683_p4 = scmp.lt.s32.totalorder %s2931_s13, %s2931_s13 }
  0x1a   : > { %p2676_p13 = scmp.ne.s32.totalorder %s2931_s13, %s2675_s12  ;;  %p2684_p2 = scmp.lt.s32.totalorder %s2675_s12, %s2675_s12 }
  0x1c   : > { %p2678_p0 = pnand %p2676_p13, %p2958_p8  ;;  %p2685_p7 = por %p2684_p2, %p2683_p4 }
  0x1e   : > { %p2679_p1 = pneg %p2678_p0 }
  0x20   : > { %p2686_p9 = pnand %p2685_p7, %p2679_p1 }
  0x22   : > { %2689 = shalt.err (!%p2686_p9)
}
  0x23   : > { %s2842_s20 = smov 256   ;;  %s2843_s22 = smov 16  }
  0x24   : > { %2380 = dma.hbm_to_vmem [thread:$0]  (!%p2941_p5), %s3165_s1, 1024, %s2931_s13, [#allocation10], %s2842_s20, %s2842_s20, %s2843_s22  }
  0x25   : > { %s3192_s18 = smov (%p2946_p6, %s35_s18), 0  ;;  %s2690_s28 = scalar_lea.hbm %s3164_s0, 64 }
  0x26   : > { %p2691_p2 = scmp.ne.s32.totalorder %s3164_s0, %s2690_s28  ;;  %p2697_p12 = scmp.lt.u32.totalorder %s2690_s28, %s3164_s0 }
  0x28   : > { %p2693_p10 = pnand %p2691_p2, %p2958_p8 }
  0x2a   : > { %p2694_p11 = pneg %p2693_p10 }
  0x2c   : > { %p2699_p13 = pnand %p2697_p12, %p2694_p11 }
  0x2e   : > { %2702 = shalt.err (!%p2699_p13)
}
  0x2f   : > { %s2703_s13 = scalar_lea.vmem %s276_s21, 64  ;;  %p2711_p4 = scmp.lt.s32.totalorder %s276_s21, %s276_s21 }
  0x30   : > { %p2704_p6 = scmp.ne.s32.totalorder %s276_s21, %s2703_s13  ;;  %p2712_p7 = scmp.lt.s32.totalorder %s2703_s13, %s2703_s13 }
  0x32   : > { %p2706_p0 = pnand %p2704_p6, %p2958_p8  ;;  %p2713_p9 = por %p2712_p7, %p2711_p4 }
  0x34   : > { %p2707_p1 = pneg %p2706_p0 }
  0x36   : > { %p2714_p3 = pnand %p2713_p9, %p2707_p1 }
  0x38   : > { %2717 = shalt.err (!%p2714_p3)
}
  0x39   : > { %2377 = dma.hbm_to_vmem [thread:$0]  (!%p2941_p5), %s3164_s0, 64, %s276_s21, [#allocation7]  }
  0x3a   : > { %s2844_s10 = smov [#allocation11]   ;;  %s2718_s24 = scalar_lea.hbm %s3168_s4, 8192 }
  0x3b   : > { %s304_s14 = sshll.u32 %s2844_s10, 4  ;;  %p2719_p2 = scmp.ne.s32.totalorder %s3168_s4, %s2718_s24  ;;  %s305_s14 = int_to_ptr.vmem [resolvable:$true] %s304_s14 }
  0x3c   : > { %p2725_p11 = scmp.lt.u32.totalorder %s2718_s24, %s3168_s4 }
  0x3d   : > { %p2721_p3 = pnand %p2719_p2, %p2958_p8 }
  0x3f   : > { %p2722_p10 = pneg %p2721_p3 }
  0x41   : > { %p2727_p12 = pnand %p2725_p11, %p2722_p10 }
  0x43   : > { %2730 = shalt.err (!%p2727_p12)
}
  0x44   : > { %s2731_s21 = scalar_lea.vmem %s305_s14, 8192  ;;  %p2739_p1 = scmp.lt.s32.totalorder %s305_s14, %s305_s14 }
  0x45   : > { %p2732_p13 = scmp.ne.s32.totalorder %s305_s14, %s2731_s21  ;;  %p2740_p4 = scmp.lt.s32.totalorder %s2731_s21, %s2731_s21 }
  0x47   : > { %p2734_p6 = pnand %p2732_p13, %p2958_p8  ;;  %p2741_p7 = por %p2740_p4, %p2739_p1 }
  0x49   : > { %p2735_p0 = pneg %p2734_p6 }
  0x4b   : > { %p2742_p9 = pnand %p2741_p7, %p2735_p0 }
  0x4d   : > { %2745 = shalt.err (!%p2742_p9)
}
  0x4e   : > { %s2845_s12 = smov 128   ;;  %s2846_s13 = smov 8  }
  0x4f   : > { %2383 = dma.hbm_to_vmem [thread:$0]  (!%p2941_p5), %s3168_s4, 8192, %s305_s14, [#allocation10], %s2845_s12, %s2845_s12, %s2846_s13  }
  0x50   : > { %s2847_s10 = smov [#allocation12]   ;;  %s2746_s25 = scalar_lea.hbm %s3171_s7, 2048 }
  0x51   : > { %s323_s22 = sshll.u32 %s2847_s10, 4  ;;  %p2747_p2 = scmp.ne.s32.totalorder %s3171_s7, %s2746_s25  ;;  %s324_s22 = int_to_ptr.vmem [resolvable:$true] %s323_s22 }
  0x52   : > { %p2753_p11 = scmp.lt.u32.totalorder %s2746_s25, %s3171_s7 }
  0x53   : > { %p2749_p3 = pnand %p2747_p2, %p2958_p8 }
  0x55   : > { %p2750_p10 = pneg %p2749_p3 }
  0x57   : > { %p2755_p12 = pnand %p2753_p11, %p2750_p10 }
  0x59   : > { %2758 = shalt.err (!%p2755_p12)
}
  0x5a   : > { %s2759_s14 = scalar_lea.vmem %s324_s22, 2048  ;;  %p2767_p1 = scmp.lt.s32.totalorder %s324_s22, %s324_s22 }
  0x5b   : > { %p2760_p13 = scmp.ne.s32.totalorder %s324_s22, %s2759_s14  ;;  %p2768_p4 = scmp.lt.s32.totalorder %s2759_s14, %s2759_s14 }
  0x5d   : > { %p2762_p6 = pnand %p2760_p13, %p2958_p8  ;;  %p2769_p7 = por %p2768_p4, %p2767_p1 }
  0x5f   : > { %p2763_p0 = pneg %p2762_p6 }
  0x61   : > { %p2770_p9 = pnand %p2769_p7, %p2763_p0 }
  0x63   : > { %2773 = shalt.err (!%p2770_p9)
}
  0x64   : > { %s2848_s12 = smov 64   ;;  %s2849_s13 = smov 4  }
  0x65   : > { %2386 = dma.hbm_to_vmem [thread:$0]  (!%p2941_p5), %s3171_s7, 2048, %s324_s22, [#allocation13], %s2848_s12, %s2848_s12, %s2849_s13  }
  0x66   : > { %p3185_p2 = scmp.ne.s32.totalorder %s3181_s16, 0 }
  0x67   : > { %p3186_p3 = scmp.ne.s32.totalorder (!%p3185_p2), %s3180_s15, 0 }
  0x68   : > { %342 = sbr.rel (%p3185_p2) target bundleno = 1269 (0x4f5), region = 56 }
  0x6f   : > { %2813 = dma.done.wait (%p3186_p3), [#allocation7], 64  }
  0x70   : > { %2815 = vsyncadd (%p3186_p3), [#allocation7], 4294967232 }
  0x71   : > { %2817 = dma.done.wait (%p3186_p3), [#allocation10], 9216  }
  0x72   : > { %2819 = vsyncadd (%p3186_p3), [#allocation10], 4294958080 }
  0x73   : > { %2821 = dma.done.wait (%p3186_p3), [#allocation13], 2048  }
  0x74   : > { %2823 = vsyncadd (%p3186_p3), [#allocation13], 4294965248  ;;  %p387_p5 = scmp.eq.s32.totalorder %s2830_s30, 0 }
  0x75   : > { %v393_v0 = vlaneseq (%p387_p5)  ;;  %v2850_v1 = vmov (%p387_p5), 0.0  }
  0x76   : > { %392 = sbr.rel (!%p387_p5) target bundleno = 125 (0x7d), region = 76 }
  0x77   : > { %vm395_vm0 = vcmp.lt.s32.totalorder (%p387_p5), %v393_v0, 512  ;;  %vm399_vm1 = vcmp.lt.s32.totalorder (%p387_p5), %v393_v0, 256 }
  0x78   : > { %397 = vst.msk [vmem:[#allocation2] sm:$0xf] (%p387_p5), %vm395_vm0, %v2850_v1  ;;  %398 = vst.msk [vmem:[#allocation3] sm:$0xf] (%p387_p5), %vm395_vm0, %v2850_v1 }
  0x79   : > { %401 = vst.msk [vmem:[#allocation4] sm:$0x3] (%p387_p5), %vm399_vm1, %v2850_v1  ;;  %402 = vst.msk [vmem:[#allocation5] sm:$0x3] (%p387_p5), %vm399_vm1, %v2850_v1 }
  0x7d PF: > { %p403_p8 = scmp.eq.s32.totalorder %s2830_s30, 1 }
  0x7e   : > { %v418_v9 = vlaneseq (%p403_p8)  ;;  %v414_v10 = vld [vmem:[%s3166_s2] sm:$0xf] (%p403_p8) }
  0x7f   : > { %407 = sbr.rel (!%p403_p8) target bundleno = 154 (0x9a), region = 80  ;;  %v408_v2 = vld [vmem:[#allocation2] sm:$0xf] (%p403_p8)  ;;  %v410_v3 = vld [vmem:[#allocation3] sm:$0xf] (%p403_p8) }
  0x80   : > { %v409_v4 = vmul.f32 (%p403_p8), 0.125, %v408_v2  ;;  %v411_v5 = vmul.f32 (%p403_p8), 0.125, %v410_v3  ;;  %vm420_vm2 = vcmp.lt.s32.totalorder (%p403_p8), %v418_v9, 512  ;;  %v423_v13 = vld [vmem:[%s3167_s3] sm:$0xf] (%p403_p8) }
  0x82   : > { %v412_v6 = vmul.f32 (%p403_p8), %v409_v4, %v409_v4 }
  0x84   : > { %v413_v7 = vsub.f32 (%p403_p8), %v411_v5, %v412_v6 }
  0x86   : > { %v415_v8 = vadd.f32 1e-05, %v413_v7 }
  0x88   : > { %2438 = vrsqrt.f32 %v415_v8 }
  0x92   : > { %v2439_v11 = vpop.eup %2438 }
  0x93   : > { %v417_v12 = vmul.f32 %v2439_v11, %v414_v10 }
  0x95   : > { %422 = vst.msk [vmem:[#allocation2] sm:$0xf] %vm420_vm2, %v417_v12  ;;  %v424_v14 = vmul.f32 %v417_v12, %v409_v4 }
  0x97   : > { %v425_v15 = vsub.f32 %v423_v13, %v424_v14 }
  0x99   : > { %426 = vst.msk [vmem:[#allocation3] sm:$0xf] %vm420_vm2, %v425_v15 }
  0x9a PF: > { %p427_p10 = scmp.eq.s32.totalorder %s2830_s30, 2 }
  0x9b   : > { %v432_v16 = vld [vmem:[#allocation4] sm:$0x3] (%p427_p10)  ;;  %v434_v17 = vld [vmem:[#allocation5] sm:$0x3] (%p427_p10)  ;;  %v442_v23 = vlaneseq (%p427_p10)  ;;  %v438_v24 = vld [vmem:[%s3169_s5] sm:$0x3] (%p427_p10) }
  0x9c   : > { %431 = sbr.rel (!%p427_p10) target bundleno = 182 (0xb6), region = 84  ;;  %v433_v18 = vmul.f32 (%p427_p10), 0.125, %v432_v16  ;;  %v435_v19 = vmul.f32 (%p427_p10), 0.125, %v434_v17  ;;  %v447_v27 = vld [vmem:[%s3170_s6] sm:$0x3] (%p427_p10) }
  0x9d   : > { %vm444_vm3 = vcmp.lt.s32.totalorder (%p427_p10), %v442_v23, 256 }
  0x9e   : > { %v436_v20 = vmul.f32 (%p427_p10), %v433_v18, %v433_v18 }
  0xa0   : > { %v437_v21 = vsub.f32 (%p427_p10), %v435_v19, %v436_v20 }
  0xa2   : > { %v439_v22 = vadd.f32 (%p427_p10), 1e-05, %v437_v21 }
  0xa4   : > { %2440 = vrsqrt.f32 %v439_v22 }
  0xae   : > { %v2441_v25 = vpop.eup %2440 }
  0xaf   : > { %v441_v26 = vmul.f32 %v2441_v25, %v438_v24 }
  0xb1   : > { %446 = vst.msk [vmem:[#allocation4] sm:$0x3] %vm444_vm3, %v441_v26  ;;  %v448_v28 = vmul.f32 %v441_v26, %v433_v18 }
  0xb3   : > { %v449_v29 = vsub.f32 %v447_v27, %v448_v28 }
  0xb5   : > { %450 = vst.msk [vmem:[#allocation5] sm:$0x3] %vm444_vm3, %v449_v29 }
  0xb6 PF: > { %v2442_v30 = vld [vmem:[#allocation9 + $0x4] ss:$16 sps:$4 sm:$0xff]   ;;  %v2444_v31 = vld [vmem:[#allocation9 + $0xc] ss:$16 sps:$4 sm:$0xff]   ;;  %v2851_v32 = vmov 0   ;;  %vm500_vm4 = vcmask 261120  }
  0xb7   : > { %536 = vmatprep.mubr.bf16.mxu0 %v2851_v32  ;;  %577 = vmatprep.mubr.bf16.mxu1 %v2851_v32  ;;  %v2446_v33 = vld [vmem:[#allocation9] ss:$16 sps:$4 sm:$0xff]   ;;  %v2447_v34 = vld [vmem:[#allocation9 + $0x8] ss:$16 sps:$4 sm:$0xff]   ;;  %v2448_v35 = vld [vmem:[#allocation9 + $0x24] ss:$16 sps:$4 sm:$0xff]  }
  0xb8   : > { %504 = vmatprep.subr.bf16.mxu0 %v2442_v30  ;;  %545 = vmatprep.subr.bf16.mxu1 %v2444_v31  ;;  %v2450_v36 = vld [vmem:[#allocation9 + $0x2c] ss:$16 sps:$4 sm:$0xff]   ;;  %v2452_v37 = vld [vmem:[#allocation9 + $0x20] ss:$16 sps:$4 sm:$0xff]   ;;  %v2453_v38 = vld [vmem:[#allocation9 + $0x28] ss:$16 sps:$4 sm:$0xff]  }
  0xb9   : > { %505 = vmatpush1.bf16.msra.mxu0 %v2446_v33  ;;  %546 = vmatpush1.bf16.msra.mxu1 %v2447_v34  ;;  %v451_v39 = vld [vmem:[#allocation6] sm:$0xf]  ;;  %p2173_p11 = scmp.ne.s32.totalorder %s2830_s30, 0 }
  0xba   : > { %506 = vmatprep.subr.bf16.mxu0 %v2448_v35  ;;  %547 = vmatprep.subr.bf16.mxu1 %v2450_v36  ;;  %v629_v52 = vlaneseq (!%p2173_p11)  ;;  %v2852_v59 = vmov (!%p2173_p11), 1966171168  }
  0xbb   : > { %v627_v60 = vunpack.c.l.s4 (!%p2173_p11), %v2852_v59 }
  0xbc   : > { %v630_v61 = vshrl.u32 (!%p2173_p11), %v629_v52, 7  ;;  %vm652_vm5 = vcmp.lt.s32.totalorder (!%p2173_p11), %v629_v52, 512 }
  0xbd   : > { %507 = vmatpush1.bf16.msra.mxu0 %v2452_v37  ;;  %548 = vmatpush1.bf16.msra.mxu1 %v2453_v38  ;;  %v628_v3 = vunpack.c.0.s8 (!%p2173_p11), %v627_v60  ;;  %v2853_v37 = vmov (!%p2173_p11), 0.0  }
  0xbe   : > { %715 = vst [vmem:[#allocation14] sm:$0xff] (!%p2173_p11), %v2853_v37 }
  0xbf   : > { %v631_v11 = vsub.s32 (!%p2173_p11), %v628_v3, %v630_v61  ;;  %v655_v61 = vld [vmem:[#allocation3] sm:$0xf] (!%p2173_p11) }
  0xc0   : > { %2171 = vmatmul.mubr.msk.bf16.vlgmr.msra.gmra.mrb[0].mxu0 %vm500_vm4, %v451_v39  ;;  %2172 = vmatmul.mubr.msk.bf16.vlgmr.msra.gmra.mrb[0].mxu1 %vm500_vm4, %v451_v39 }
 0x190   : > { %588 = sbr.rel (%p2173_p11) target bundleno = 430 (0x1ae), region = 88 }
 0x193   : > { %v3066_v40 = vpop.f32.mrb[0].mxu0  ;;  %v3068_v41 = vpop.f32.mrb[0].mxu1 }
 0x194   : > { %v3070_v42 = vpop.f32.mrb[1].mxu0  ;;  %v3072_v43 = vpop.f32.mrb[1].mxu1  ;;  %v596_v48 = vrot.slane (!%p2173_p11), %v3066_v40, 4  ;;  %v608_v50 = vrot.slane (!%p2173_p11), %v3068_v41, 4  ;;  %v656_v53 = vmul.f32 (!%p2173_p11), %v3066_v40, %v3066_v40  ;;  %v658_v62 = vmul.f32 (!%p2173_p11), %v3068_v41, %v3068_v41 }
 0x195   : > { %v542_v44 = vpop.f32.mrb[2].mxu0  ;;  %v583_v45 = vpop.f32.mrb[2].mxu1  ;;  %v602_v49 = vrot.slane (!%p2173_p11), %v3070_v42, 4  ;;  %v614_v51 = vrot.slane (!%p2173_p11), %v3072_v43, 4  ;;  %v657_v54 = vmul.f32 (!%p2173_p11), %v3070_v42, %v3070_v42  ;;  %v659_v4 = vmul.f32 (!%p2173_p11), %v3072_v43, %v3072_v43 }
 0x196   : > { %v543_v46 = vpop.f32.mrb[3].mxu0  ;;  %v584_v47 = vpop.f32.mrb[3].mxu1  ;;  %v597_v55 = vadd.f32 (!%p2173_p11), %v596_v48, %v3066_v40  ;;  %v609_v57 = vadd.f32 (!%p2173_p11), %v608_v50, %v3068_v41  ;;  %v660_v5 = vrot.slane (!%p2173_p11), %v656_v53, 4  ;;  %v672_v14 = vrot.slane (!%p2173_p11), %v658_v62, 4 }
 0x197   : > { %v603_v56 = vadd.f32 %v602_v49, %v3070_v42  ;;  %v615_v58 = vadd.f32 %v614_v51, %v3072_v43  ;;  %v666_v6 = vrot.slane %v657_v54, 4  ;;  %v678_v22 = vrot.slane %v659_v4, 4  ;;  %v595_v49 = vld [vmem:[#allocation2] sm:$0xf] }
 0x198   : > { %v598_v63 = vrot.slane %v597_v55, 2  ;;  %v610_v1 = vrot.slane %v609_v57, 2  ;;  %v661_v12 = vadd.f32 %v660_v5, %v656_v53  ;;  %v673_v21 = vadd.f32 %v672_v14, %v658_v62 }
 0x199   : > { %v604_v0 = vrot.slane %v603_v56, 2  ;;  %v616_v2 = vrot.slane %v615_v58, 2  ;;  %v667_v13 = vadd.f32 %v666_v6, %v657_v54  ;;  %v679_v30 = vadd.f32 %v678_v22, %v659_v4 }
 0x19a   : > { %v599_v7 = vadd.f32 %v598_v63, %v597_v55  ;;  %v611_v9 = vadd.f32 %v610_v1, %v609_v57  ;;  %v662_v19 = vrot.slane %v661_v12, 2  ;;  %v674_v29 = vrot.slane %v673_v21, 2 }
 0x19b   : > { %v605_v8 = vadd.f32 %v604_v0, %v603_v56  ;;  %v617_v10 = vadd.f32 %v616_v2, %v615_v58  ;;  %v668_v20 = vrot.slane %v667_v13, 2  ;;  %v680_v36 = vrot.slane %v679_v30, 2 }
 0x19c   : > { %v600_v15 = vrot.slane %v599_v7, 1  ;;  %v612_v17 = vrot.slane %v611_v9, 1  ;;  %v663_v27 = vadd.f32 %v662_v19, %v661_v12  ;;  %v675_v35 = vadd.f32 %v674_v29, %v673_v21 }
 0x19d   : > { %v606_v16 = vrot.slane %v605_v8, 1  ;;  %v618_v18 = vrot.slane %v617_v10, 1  ;;  %v669_v28 = vadd.f32 %v668_v20, %v667_v13  ;;  %v681_v47 = vadd.f32 %v680_v36, %v679_v30 }
 0x19e   : > { %v601_v23 = vadd.f32 %v600_v15, %v599_v7  ;;  %v613_v25 = vadd.f32 %v612_v17, %v611_v9  ;;  %v664_v33 = vrot.slane %v663_v27, 1  ;;  %v676_v46 = vrot.slane %v675_v35, 1 }
 0x19f   : > { %v607_v24 = vadd.f32 %v606_v16, %v605_v8  ;;  %v619_v26 = vadd.f32 %v618_v18, %v617_v10  ;;  %v670_v34 = vrot.slane %v669_v28, 1  ;;  %v682_v51 = vrot.slane %v681_v47, 1 }
 0x1a0   : > { %v665_v44 = vadd.f32 %v664_v33, %v663_v27  ;;  %v677_v50 = vadd.f32 %v676_v46, %v675_v35 }
 0x1a1   : > { %v624_v31 = vcombine.low %v601_v23, %v607_v24  ;;  %v625_v32 = vcombine.low %v613_v25, %v619_v26  ;;  %v671_v45 = vadd.f32 %v670_v34, %v669_v28  ;;  %v683_v55 = vadd.f32 %v682_v51, %v681_v47 }
 0x1a3   : > { %v632_v38 = vrot.slane %v624_v31, %v631_v11  ;;  %v639_v39 = vrot.slane %v625_v32, %v631_v11  ;;  %v688_v53 = vcombine.low %v665_v44, %v671_v45  ;;  %v689_v57 = vcombine.low %v677_v50, %v683_v55 }
 0x1a5   : > { %v640_v48 = vcombine.low %v632_v38, %v639_v39  ;;  %v696_v58 = vrot.slane %v688_v53, %v631_v11  ;;  %v703_v59 = vrot.slane %v689_v57, %v631_v11 }
 0x1a7   : > { %v647_v54 = vrot.slane %v640_v48, %v631_v11  ;;  %v704_v60 = vcombine.low %v696_v58, %v703_v59 }
 0x1a9   : > { %v649_v56 = vadd.f32 %v647_v54, %v595_v49  ;;  %v711_v62 = vrot.slane %v704_v60, %v631_v11 }
 0x1ab   : > { %654 = vst.msk [vmem:[#allocation2] sm:$0xf] %vm652_vm5, %v649_v56  ;;  %v713_v63 = vadd.f32 %v711_v62, %v655_v61 }
 0x1ad   : > { %714 = vst.msk [vmem:[#allocation3] sm:$0xf] %vm652_vm5, %v713_v63 }
 0x1ae PF: > { %p2174_p12 = scmp.ne.s32.totalorder %s2830_s30, 1 }
 0x1af   : > { %v2454_v0 = vld [vmem:[#allocation11 + $0x4] ss:$8 sps:$4 sm:$0xff] (!%p2174_p12)   ;;  %v2458_v2 = vld [vmem:[#allocation11] ss:$8 sps:$4 sm:$0xff] (!%p2174_p12)   ;;  %v2460_v3 = vld [vmem:[#allocation11 + $0x14] ss:$8 sps:$4 sm:$0xff] (!%p2174_p12)   ;;  %v721_v35 = vlaneseq (!%p2174_p12) }
 0x1b0   : > { %718 = sbr.rel (%p2174_p12) target bundleno = 735 (0x2df), region = 92  ;;  %v2456_v1 = vld [vmem:[#allocation11 + $0x104] ss:$8 sps:$4 sm:$0xff] (!%p2174_p12)   ;;  %1163 = vmatprep.subr.bf16.mxu1 (!%p2174_p12), %v2454_v0  ;;  %v2459_v52 = vld [vmem:[#allocation11 + $0x100] ss:$8 sps:$4 sm:$0xff] (!%p2174_p12)  }
 0x1b1   : > { %1204 = vmatprep.subr.bf16.mxu0 (!%p2174_p12), %v2456_v1  ;;  %1164 = vmatpush1.bf16.msra.mxu1 (!%p2174_p12), %v2458_v2  ;;  %v2462_v4 = vld [vmem:[#allocation11 + $0x114] ss:$8 sps:$4 sm:$0xff] (!%p2174_p12)   ;;  %v2464_v5 = vld [vmem:[#allocation11 + $0x10] ss:$8 sps:$4 sm:$0xff] (!%p2174_p12)   ;;  %v2466_v7 = vld [vmem:[#allocation11 + $0x24] ss:$8 sps:$4 sm:$0xff] (!%p2174_p12)  }
 0x1b2   : > { %1205 = vmatpush1.bf16.msra.mxu0 (!%p2174_p12), %v2459_v52  ;;  %1165 = vmatprep.subr.bf16.mxu1 (!%p2174_p12), %v2460_v3  ;;  %v2465_v6 = vld [vmem:[#allocation11 + $0x110] ss:$8 sps:$4 sm:$0xff] (!%p2174_p12)   ;;  %v2468_v8 = vld [vmem:[#allocation11 + $0x124] ss:$8 sps:$4 sm:$0xff] (!%p2174_p12)   ;;  %v2470_v9 = vld [vmem:[#allocation11 + $0x20] ss:$8 sps:$4 sm:$0xff] (!%p2174_p12)  }
 0x1b3   : > { %1206 = vmatprep.subr.bf16.mxu0 (!%p2174_p12), %v2462_v4  ;;  %v2471_v10 = vld [vmem:[#allocation11 + $0x120] ss:$8 sps:$4 sm:$0xff] (!%p2174_p12)   ;;  %v2472_v11 = vld [vmem:[#allocation11 + $0x34] ss:$8 sps:$4 sm:$0xff] (!%p2174_p12)   ;;  %v2476_v13 = vld [vmem:[#allocation11 + $0x30] ss:$8 sps:$4 sm:$0xff] (!%p2174_p12)  }
 0x1b4   : > { %v2474_v12 = vld [vmem:[#allocation11 + $0x134] ss:$8 sps:$4 sm:$0xff] (!%p2174_p12)   ;;  %v2477_v14 = vld [vmem:[#allocation11 + $0x130] ss:$8 sps:$4 sm:$0xff] (!%p2174_p12)   ;;  %v2478_v15 = vld [vmem:[#allocation11 + $0x44] ss:$8 sps:$4 sm:$0xff] (!%p2174_p12)  }
 0x1b5   : > { %1166 = vmatpush1.bf16.msra.mxu1 (!%p2174_p12), %v2464_v5  ;;  %v2480_v16 = vld [vmem:[#allocation11 + $0x144] ss:$8 sps:$4 sm:$0xff] (!%p2174_p12)   ;;  %v2482_v17 = vld [vmem:[#allocation11 + $0x40] ss:$8 sps:$4 sm:$0xff] (!%p2174_p12)   ;;  %v2484_v19 = vld [vmem:[#allocation11 + $0x54] ss:$8 sps:$4 sm:$0xff] (!%p2174_p12)  }
 0x1b6   : > { %1207 = vmatpush1.bf16.msra.mxu0 (!%p2174_p12), %v2465_v6  ;;  %1167 = vmatprep.subr.bf16.mxu1 (!%p2174_p12), %v2466_v7  ;;  %v2483_v18 = vld [vmem:[#allocation11 + $0x140] ss:$8 sps:$4 sm:$0xff] (!%p2174_p12)   ;;  %v2486_v20 = vld [vmem:[#allocation11 + $0x154] ss:$8 sps:$4 sm:$0xff] (!%p2174_p12)   ;;  %v2488_v21 = vld [vmem:[#allocation11 + $0x50] ss:$8 sps:$4 sm:$0xff] (!%p2174_p12)  }
 0x1b7   : > { %1208 = vmatprep.subr.bf16.mxu0 %v2468_v8  ;;  %v2489_v22 = vld [vmem:[#allocation11 + $0x150] ss:$8 sps:$4 sm:$0xff]   ;;  %v2490_v23 = vld [vmem:[#allocation11 + $0x64] ss:$8 sps:$4 sm:$0xff]   ;;  %v2494_v25 = vld [vmem:[#allocation11 + $0x60] ss:$8 sps:$4 sm:$0xff]  }
 0x1b8   : > { %v2492_v24 = vld [vmem:[#allocation11 + $0x164] ss:$8 sps:$4 sm:$0xff]   ;;  %v2495_v26 = vld [vmem:[#allocation11 + $0x160] ss:$8 sps:$4 sm:$0xff]   ;;  %v2496_v27 = vld [vmem:[#allocation11 + $0x74] ss:$8 sps:$4 sm:$0xff]  }
 0x1b9   : > { %1168 = vmatpush1.bf16.msra.mxu1 %v2470_v9  ;;  %v2498_v28 = vld [vmem:[#allocation11 + $0x174] ss:$8 sps:$4 sm:$0xff]   ;;  %v2500_v29 = vld [vmem:[#allocation11 + $0x70] ss:$8 sps:$4 sm:$0xff]   ;;  %v2502_v31 = vld [vmem:[#allocation11 + $0x84] ss:$8 sps:$4 sm:$0xff]  }
 0x1ba   : > { %1209 = vmatpush1.bf16.msra.mxu0 %v2471_v10  ;;  %1169 = vmatprep.subr.bf16.mxu1 %v2472_v11  ;;  %v2501_v30 = vld [vmem:[#allocation11 + $0x170] ss:$8 sps:$4 sm:$0xff]   ;;  %v2504_v32 = vld [vmem:[#allocation11 + $0x184] ss:$8 sps:$4 sm:$0xff]   ;;  %v2506_v33 = vld [vmem:[#allocation11 + $0x80] ss:$8 sps:$4 sm:$0xff]  }
 0x1bb   : > { %1210 = vmatprep.subr.bf16.mxu0 %v2474_v12  ;;  %v2507_v34 = vld [vmem:[#allocation11 + $0x180] ss:$8 sps:$4 sm:$0xff]   ;;  %v2508_v36 = vld [vmem:[#allocation11 + $0x94] ss:$8 sps:$4 sm:$0xff]   ;;  %v2512_v38 = vld [vmem:[#allocation11 + $0x90] ss:$8 sps:$4 sm:$0xff]  }
 0x1bc   : > { %v2510_v37 = vld [vmem:[#allocation11 + $0x194] ss:$8 sps:$4 sm:$0xff]   ;;  %v3095_v39 = vshrl.u32 %v721_v35, 7  ;;  %v2513_v44 = vld [vmem:[#allocation11 + $0x190] ss:$8 sps:$4 sm:$0xff]   ;;  %vm1283_vm6 = vcmp.lt.s32.totalorder %v721_v35, 256 }
 0x1bd   : > { %1170 = vmatpush1.bf16.msra.mxu1 %v2476_v13  ;;  %v2514_v45 = vld [vmem:[#allocation11 + $0xa4] ss:$8 sps:$4 sm:$0xff]   ;;  %v2518_v47 = vld [vmem:[#allocation11 + $0xa0] ss:$8 sps:$4 sm:$0xff]   ;;  %v2520_v51 = vld [vmem:[#allocation11 + $0xb4] ss:$8 sps:$4 sm:$0xff]  }
 0x1be   : > { %1211 = vmatpush1.bf16.msra.mxu0 %v2477_v14  ;;  %1171 = vmatprep.subr.bf16.mxu1 %v2478_v15  ;;  %v2516_v46 = vld [vmem:[#allocation11 + $0x1a4] ss:$8 sps:$4 sm:$0xff]   ;;  %v2519_v48 = vld [vmem:[#allocation11 + $0x1a0] ss:$8 sps:$4 sm:$0xff]   ;;  %v727_v49 = vsub.s32 1, %v3095_v39  ;;  %v735_v50 = vsub.s32 3, %v3095_v39 }
 0x1bf   : > { %1212 = vmatprep.subr.bf16.mxu0 %v2480_v16  ;;  %v2522_v53 = vld [vmem:[#allocation11 + $0x1b4] ss:$8 sps:$4 sm:$0xff]   ;;  %v719_v54 = vld [vmem:[#allocation2] sm:$0xf]  ;;  %v723_v55 = vsub.s32 0, %v3095_v39  ;;  %v731_v59 = vsub.s32 2, %v3095_v39 }
 0x1c0   : > { %v728_v56 = vrot.slane %v719_v54, %v727_v49  ;;  %v745_v57 = vld [vmem:[#allocation3] sm:$0xf]  ;;  %v736_v58 = vrot.slane %v719_v54, %v735_v50  ;;  %v2524_v60 = vld [vmem:[#allocation11 + $0xb0] ss:$8 sps:$4 sm:$0xff]   ;;  %v2526_v0 = vld [vmem:[#allocation11 + $0xc4] ss:$8 sps:$4 sm:$0xff]  }
 0x1c1   : > { %1172 = vmatpush1.bf16.msra.mxu1 %v2482_v17  ;;  %v2525_v61 = vld [vmem:[#allocation11 + $0x1b0] ss:$8 sps:$4 sm:$0xff]   ;;  %v754_v62 = vrot.slane %v745_v57, %v727_v49  ;;  %v762_v63 = vrot.slane %v745_v57, %v735_v50  ;;  %v2528_v1 = vld [vmem:[#allocation11 + $0x1c4] ss:$8 sps:$4 sm:$0xff]   ;;  %v724_v3 = vrot.slane %v719_v54, %v723_v55  ;;  %v732_v6 = vrot.slane %v719_v54, %v731_v59  ;;  %v2530_v7 = vld [vmem:[#allocation11 + $0xc0] ss:$8 sps:$4 sm:$0xff]  }
 0x1c2   : > { %1213 = vmatpush1.bf16.msra.mxu0 %v2483_v18  ;;  %1173 = vmatprep.subr.bf16.mxu1 %v2484_v19  ;;  %v742_v2 = vmul.f32 %v728_v56, %v3070_v42  ;;  %v744_v52 = vmul.f32 %v736_v58, %v3072_v43  ;;  %v2531_v8 = vld [vmem:[#allocation11 + $0x1c0] ss:$8 sps:$4 sm:$0xff]   ;;  %v2532_v9 = vld [vmem:[#allocation11 + $0xd4] ss:$8 sps:$4 sm:$0xff]   ;;  %v750_v14 = vrot.slane %v745_v57, %v723_v55  ;;  %v2536_v19 = vld [vmem:[#allocation11 + $0xd0] ss:$8 sps:$4 sm:$0xff]  }
 0x1c3   : > { %1214 = vmatprep.subr.bf16.mxu0 %v2486_v20  ;;  %v2534_v10 = vld [vmem:[#allocation11 + $0x1d4] ss:$8 sps:$4 sm:$0xff]   ;;  %v741_v13 = vmul.f32 %v724_v3, %v3066_v40  ;;  %v743_v17 = vmul.f32 %v732_v6, %v3068_v41  ;;  %v758_v18 = vrot.slane %v745_v57, %v731_v59  ;;  %v2537_v20 = vld [vmem:[#allocation11 + $0x1d0] ss:$8 sps:$4 sm:$0xff]  }
 0x1c4   : > { %v768_v4 = vadd.f32 %v754_v62, %v742_v2  ;;  %v770_v5 = vadd.f32 %v762_v63, %v744_v52 }
 0x1c5   : > { %1174 = vmatpush1.bf16.msra.mxu1 %v2488_v21  ;;  %v2538_v21 = vld [vmem:[#allocation11 + $0xe4] ss:$8 sps:$4 sm:$0xff]  }
 0x1c6   : > { %1215 = vmatpush1.bf16.msra.mxu0 %v2489_v22  ;;  %1175 = vmatprep.subr.bf16.mxu1 %v2490_v23  ;;  %v772_v11 = vmax.f32 %v768_v4, 0.0  ;;  %v774_v12 = vmax.f32 %v770_v5, 0.0  ;;  %v2540_v22 = vld [vmem:[#allocation11 + $0x1e4] ss:$8 sps:$4 sm:$0xff]   ;;  %v767_v23 = vadd.f32 %v750_v14, %v741_v13 }
 0x1c7   : > { %1216 = vmatprep.subr.bf16.mxu0 %v2492_v24  ;;  %v769_v24 = vadd.f32 %v758_v18, %v743_v17 }
 0x1c8   : > { %v776_v15 = vpack.c.bf16 %v772_v11, %v772_v11  ;;  %v778_v16 = vpack.c.bf16 %v774_v12, %v774_v12 }
 0x1c9   : > { %1176 = vmatpush1.bf16.msra.mxu1 %v2494_v25  ;;  %v2542_v25 = vld [vmem:[#allocation11 + $0xe0] ss:$8 sps:$4 sm:$0xff]  }
 0x1ca   : > { %1217 = vmatpush1.bf16.msra.mxu0 %v2495_v26  ;;  %1177 = vmatprep.subr.bf16.mxu1 %v2496_v27  ;;  %v2543_v26 = vld [vmem:[#allocation11 + $0x1e0] ss:$8 sps:$4 sm:$0xff]   ;;  %v2544_v27 = vld [vmem:[#allocation11 + $0xf4] ss:$8 sps:$4 sm:$0xff]  }
 0x1cb   : > { %1218 = vmatprep.subr.bf16.mxu0 %v2498_v28  ;;  %1195 = vmatprep.mubr.bf16.mxu1 %v776_v15  ;;  %v2546_v28 = vld [vmem:[#allocation11 + $0x1f4] ss:$8 sps:$4 sm:$0xff]  }
 0x1cc   : > { %1236 = vmatprep.mubr.bf16.mxu0 %v778_v16 }
 0x1cd   : > { %1178 = vmatpush1.bf16.msra.mxu1 %v2500_v29  ;;  %v771_v29 = vmax.f32 %v767_v23, 0.0 }
 0x1ce   : > { %1219 = vmatpush1.bf16.msra.mxu0 %v2501_v30  ;;  %1179 = vmatprep.subr.bf16.mxu1 %v2502_v31  ;;  %v773_v30 = vmax.f32 %v769_v24, 0.0  ;;  %v2548_v31 = vld [vmem:[#allocation11 + $0xf0] ss:$8 sps:$4 sm:$0xff]  }
 0x1cf   : > { %1220 = vmatprep.subr.bf16.mxu0 %v2504_v32  ;;  %v2549_v32 = vld [vmem:[#allocation11 + $0x1f0] ss:$8 sps:$4 sm:$0xff]  }
 0x1d0   : > { %v1286_v24 = vld [vmem:[#allocation5] sm:$0x3] }
 0x1d1   : > { %1180 = vmatpush1.bf16.msra.mxu1 %v2506_v33  ;;  %v775_v33 = vpack.c.bf16 %v771_v29, %v771_v29 }
 0x1d2   : > { %1221 = vmatpush1.bf16.msra.mxu0 %v2507_v34  ;;  %1181 = vmatprep.subr.bf16.mxu1 %v2508_v36  ;;  %v777_v34 = vpack.c.bf16 %v773_v30, %v773_v30  ;;  %v2854_v36 = vmov 0.0  }
 0x1d3   : > { %1222 = vmatprep.subr.bf16.mxu0 %v2510_v37  ;;  %1321 = vst [vmem:[#allocation14] sm:$0xff] %v2854_v36 }
 0x1d5   : > { %1182 = vmatpush1.bf16.msra.mxu1 %v2512_v38 }
 0x1d6   : > { %1223 = vmatpush1.bf16.msra.mxu0 %v2513_v44  ;;  %1183 = vmatprep.subr.bf16.mxu1 %v2514_v45 }
 0x1d7   : > { %1224 = vmatprep.subr.bf16.mxu0 %v2516_v46 }
 0x1d9   : > { %1184 = vmatpush1.bf16.msra.mxu1 %v2518_v47 }
 0x1da   : > { %1225 = vmatpush1.bf16.msra.mxu0 %v2519_v48  ;;  %1185 = vmatprep.subr.bf16.mxu1 %v2520_v51 }
 0x1db   : > { %1226 = vmatprep.subr.bf16.mxu0 %v2522_v53 }
 0x1dd   : > { %1186 = vmatpush1.bf16.msra.mxu1 %v2524_v60  ;;  %v2855_v60 = vmov 1966171168  }
 0x1de   : > { %1227 = vmatpush1.bf16.msra.mxu0 %v2525_v61  ;;  %1187 = vmatprep.subr.bf16.mxu1 %v2526_v0  ;;  %v1266_v61 = vunpack.c.l.s4 %v2855_v60 }
 0x1df   : > { %1228 = vmatprep.subr.bf16.mxu0 %v2528_v1 }
 0x1e0   : > { %v1267_v5 = vunpack.c.0.s8 %v1266_v61 }
 0x1e1   : > { %1188 = vmatpush1.bf16.msra.mxu1 %v2530_v7 }
 0x1e2   : > { %1229 = vmatpush1.bf16.msra.mxu0 %v2531_v8  ;;  %1189 = vmatprep.subr.bf16.mxu1 %v2532_v9  ;;  %v1270_v14 = vsub.s32 %v1267_v5, %v3095_v39 }
 0x1e3   : > { %1230 = vmatprep.subr.bf16.mxu0 %v2534_v10 }
 0x1e5   : > { %1190 = vmatpush1.bf16.msra.mxu1 %v2536_v19 }
 0x1e6   : > { %1231 = vmatpush1.bf16.msra.mxu0 %v2537_v20  ;;  %1191 = vmatprep.subr.bf16.mxu1 %v2538_v21  ;;  %v1249_v21 = vld [vmem:[#allocation4] sm:$0x3] }
 0x1e7   : > { %1232 = vmatprep.subr.bf16.mxu0 %v2540_v22 }
 0x1e9   : > { %1192 = vmatpush1.bf16.msra.mxu1 %v2542_v25 }
 0x1ea   : > { %1233 = vmatpush1.bf16.msra.mxu0 %v2543_v26  ;;  %1193 = vmatprep.subr.bf16.mxu1 %v2544_v27 }
 0x1eb   : > { %1234 = vmatprep.subr.bf16.mxu0 %v2546_v28 }
 0x1ed   : > { %1194 = vmatpush1.bf16.msra.mxu1 %v2548_v31 }
 0x1ee   : > { %1235 = vmatpush1.bf16.msra.mxu0 %v2549_v32 }
 0x1f0   : > { %1196 = vmatmul.mubr.bf16.vlgmr.msra.gmra.mrb[0].mxu1 %v775_v33 }
 0x1f1   : > { %1237 = vmatmul.mubr.bf16.vlgmr.msra.gmra.mrb[0].mxu0 %v777_v34 }
 0x2c3   : > { %v1197_v37 = vpop.f32.mrb[0].mxu1 }
 0x2c4   : > { %v1238_v38 = vpop.f32.mrb[0].mxu0  ;;  %v1199_v45 = vpop.f32.mrb[1].mxu1 }
 0x2c5   : > { %v1239_v44 = vadd.f32 %v1238_v38, %v1197_v37  ;;  %v1240_v46 = vpop.f32.mrb[1].mxu0  ;;  %v1201_v48 = vpop.f32.mrb[2].mxu1 }
 0x2c6   : > { %v1241_v47 = vadd.f32 %v1240_v46, %v1199_v45  ;;  %v1242_v49 = vpop.f32.mrb[2].mxu0  ;;  %v1202_v53 = vpop.f32.mrb[3].mxu1 }
 0x2c7   : > { %v1250_v50 = vrot.slane %v1239_v44, 4  ;;  %v1287_v51 = vmul.f32 %v1239_v44, %v1239_v44  ;;  %v1243_v54 = vpop.f32.mrb[3].mxu0 }
 0x2c8   : > { %v1256_v55 = vrot.slane %v1241_v47, 4  ;;  %v1288_v56 = vmul.f32 %v1241_v47, %v1241_v47 }
 0x2c9   : > { %v1251_v57 = vadd.f32 %v1250_v50, %v1239_v44  ;;  %v1289_v58 = vrot.slane %v1287_v51, 4 }
 0x2ca   : > { %v1257_v59 = vadd.f32 %v1256_v55, %v1241_v47  ;;  %v1295_v62 = vrot.slane %v1288_v56, 4 }
 0x2cb   : > { %v1252_v63 = vrot.slane %v1251_v57, 2  ;;  %v1290_v0 = vadd.f32 %v1289_v58, %v1287_v51 }
 0x2cc   : > { %v1258_v1 = vrot.slane %v1257_v59, 2  ;;  %v1296_v2 = vadd.f32 %v1295_v62, %v1288_v56 }
 0x2cd   : > { %v1253_v52 = vadd.f32 %v1252_v63, %v1251_v57  ;;  %v1291_v3 = vrot.slane %v1290_v0, 2 }
 0x2ce   : > { %v1259_v4 = vadd.f32 %v1258_v1, %v1257_v59  ;;  %v1297_v6 = vrot.slane %v1296_v2, 2 }
 0x2cf   : > { %v1254_v7 = vrot.slane %v1253_v52, 1  ;;  %v1292_v8 = vadd.f32 %v1291_v3, %v1290_v0 }
 0x2d0   : > { %v1260_v9 = vrot.slane %v1259_v4, 1  ;;  %v1298_v10 = vadd.f32 %v1297_v6, %v1296_v2 }
 0x2d1   : > { %v1255_v11 = vadd.f32 %v1254_v7, %v1253_v52  ;;  %v1293_v12 = vrot.slane %v1292_v8, 1 }
 0x2d2   : > { %v1261_v13 = vadd.f32 %v1260_v9, %v1259_v4  ;;  %v1299_v15 = vrot.slane %v1298_v10, 1 }
 0x2d3   : > { %v1294_v16 = vadd.f32 %v1293_v12, %v1292_v8 }
 0x2d4   : > { %v1264_v17 = vcombine.low %v1255_v11, %v1261_v13  ;;  %v1300_v18 = vadd.f32 %v1299_v15, %v1298_v10 }
 0x2d6   : > { %v1271_v19 = vrot.slane %v1264_v17, %v1270_v14  ;;  %v1303_v20 = vcombine.low %v1294_v16, %v1300_v18 }
 0x2d8   : > { %v1278_v22 = vrot.slane %v1271_v19, %v1270_v14  ;;  %v1310_v23 = vrot.slane %v1303_v20, %v1270_v14 }
 0x2da   : > { %v1280_v25 = vadd.f32 %v1278_v22, %v1249_v21  ;;  %v1317_v26 = vrot.slane %v1310_v23, %v1270_v14 }
 0x2dc   : > { %1285 = vst.msk [vmem:[#allocation4] sm:$0x3] %vm1283_vm6, %v1280_v25  ;;  %v1319_v27 = vadd.f32 %v1317_v26, %v1286_v24 }
 0x2de   : > { %1320 = vst.msk [vmem:[#allocation5] sm:$0x3] %vm1283_vm6, %v1319_v27 }
 0x2df PF: > { %p2239_p13 = scmp.ne.s32.totalorder %s2830_s30, 2 }
 0x2e0   : > { %v2550_v39 = vld [vmem:[#allocation11 + $0x4] ss:$8 sps:$4 sm:$0xff] (!%p2239_p13)   ;;  %v2554_v29 = vld [vmem:[#allocation11] ss:$8 sps:$4 sm:$0xff] (!%p2239_p13)   ;;  %v2556_v31 = vld [vmem:[#allocation11 + $0x14] ss:$8 sps:$4 sm:$0xff] (!%p2239_p13)   ;;  %v1327_v4 = vlaneseq (!%p2239_p13) }
 0x2e1   : > { %1324 = sbr.rel (%p2239_p13) target bundleno = 1244 (0x4dc), region = 96  ;;  %v2552_v28 = vld [vmem:[#allocation11 + $0x104] ss:$8 sps:$4 sm:$0xff] (!%p2239_p13)   ;;  %1769 = vmatprep.subr.bf16.mxu1 (!%p2239_p13), %v2550_v39  ;;  %v2555_v30 = vld [vmem:[#allocation11 + $0x100] ss:$8 sps:$4 sm:$0xff] (!%p2239_p13)  }
 0x2e2   : > { %1810 = vmatprep.subr.bf16.mxu0 (!%p2239_p13), %v2552_v28  ;;  %1770 = vmatpush1.bf16.msra.mxu1 (!%p2239_p13), %v2554_v29  ;;  %v2558_v35 = vld [vmem:[#allocation11 + $0x114] ss:$8 sps:$4 sm:$0xff] (!%p2239_p13)   ;;  %v2560_v32 = vld [vmem:[#allocation11 + $0x10] ss:$8 sps:$4 sm:$0xff] (!%p2239_p13)   ;;  %v2562_v34 = vld [vmem:[#allocation11 + $0x24] ss:$8 sps:$4 sm:$0xff] (!%p2239_p13)  }
 0x2e3   : > { %1811 = vmatpush1.bf16.msra.mxu0 (!%p2239_p13), %v2555_v30  ;;  %1771 = vmatprep.subr.bf16.mxu1 (!%p2239_p13), %v2556_v31  ;;  %v2561_v33 = vld [vmem:[#allocation11 + $0x110] ss:$8 sps:$4 sm:$0xff] (!%p2239_p13)   ;;  %v2564_v36 = vld [vmem:[#allocation11 + $0x124] ss:$8 sps:$4 sm:$0xff] (!%p2239_p13)   ;;  %v2566_v37 = vld [vmem:[#allocation11 + $0x20] ss:$8 sps:$4 sm:$0xff] (!%p2239_p13)  }
 0x2e4   : > { %1812 = vmatprep.subr.bf16.mxu0 (!%p2239_p13), %v2558_v35  ;;  %v2567_v38 = vld [vmem:[#allocation11 + $0x120] ss:$8 sps:$4 sm:$0xff] (!%p2239_p13)   ;;  %v2568_v44 = vld [vmem:[#allocation11 + $0x34] ss:$8 sps:$4 sm:$0xff] (!%p2239_p13)   ;;  %v2572_v46 = vld [vmem:[#allocation11 + $0x30] ss:$8 sps:$4 sm:$0xff] (!%p2239_p13)  }
 0x2e5   : > { %v2570_v45 = vld [vmem:[#allocation11 + $0x134] ss:$8 sps:$4 sm:$0xff] (!%p2239_p13)   ;;  %v2573_v47 = vld [vmem:[#allocation11 + $0x130] ss:$8 sps:$4 sm:$0xff] (!%p2239_p13)   ;;  %v2574_v48 = vld [vmem:[#allocation11 + $0x44] ss:$8 sps:$4 sm:$0xff] (!%p2239_p13)  }
 0x2e6   : > { %1772 = vmatpush1.bf16.msra.mxu1 (!%p2239_p13), %v2560_v32  ;;  %v2576_v49 = vld [vmem:[#allocation11 + $0x144] ss:$8 sps:$4 sm:$0xff] (!%p2239_p13)   ;;  %v2578_v50 = vld [vmem:[#allocation11 + $0x40] ss:$8 sps:$4 sm:$0xff] (!%p2239_p13)   ;;  %v2580_v53 = vld [vmem:[#allocation11 + $0x54] ss:$8 sps:$4 sm:$0xff] (!%p2239_p13)  }
 0x2e7   : > { %1813 = vmatpush1.bf16.msra.mxu0 (!%p2239_p13), %v2561_v33  ;;  %1773 = vmatprep.subr.bf16.mxu1 (!%p2239_p13), %v2562_v34  ;;  %v2579_v51 = vld [vmem:[#allocation11 + $0x140] ss:$8 sps:$4 sm:$0xff] (!%p2239_p13)   ;;  %v2582_v54 = vld [vmem:[#allocation11 + $0x154] ss:$8 sps:$4 sm:$0xff] (!%p2239_p13)   ;;  %v2584_v55 = vld [vmem:[#allocation11 + $0x50] ss:$8 sps:$4 sm:$0xff] (!%p2239_p13)  }
 0x2e8   : > { %1814 = vmatprep.subr.bf16.mxu0 %v2564_v36  ;;  %v2585_v56 = vld [vmem:[#allocation11 + $0x150] ss:$8 sps:$4 sm:$0xff]   ;;  %v2586_v57 = vld [vmem:[#allocation11 + $0x64] ss:$8 sps:$4 sm:$0xff]   ;;  %v2590_v59 = vld [vmem:[#allocation11 + $0x60] ss:$8 sps:$4 sm:$0xff]  }
 0x2e9   : > { %v2588_v58 = vld [vmem:[#allocation11 + $0x164] ss:$8 sps:$4 sm:$0xff]   ;;  %v2591_v60 = vld [vmem:[#allocation11 + $0x160] ss:$8 sps:$4 sm:$0xff]   ;;  %v2592_v61 = vld [vmem:[#allocation11 + $0x74] ss:$8 sps:$4 sm:$0xff]  }
 0x2ea   : > { %1774 = vmatpush1.bf16.msra.mxu1 %v2566_v37  ;;  %v2594_v62 = vld [vmem:[#allocation11 + $0x174] ss:$8 sps:$4 sm:$0xff]   ;;  %v2596_v63 = vld [vmem:[#allocation11 + $0x70] ss:$8 sps:$4 sm:$0xff]   ;;  %v2598_v1 = vld [vmem:[#allocation11 + $0x84] ss:$8 sps:$4 sm:$0xff]  }
 0x2eb   : > { %1815 = vmatpush1.bf16.msra.mxu0 %v2567_v38  ;;  %1775 = vmatprep.subr.bf16.mxu1 %v2568_v44  ;;  %v2597_v0 = vld [vmem:[#allocation11 + $0x170] ss:$8 sps:$4 sm:$0xff]   ;;  %v2600_v2 = vld [vmem:[#allocation11 + $0x184] ss:$8 sps:$4 sm:$0xff]   ;;  %v2602_v52 = vld [vmem:[#allocation11 + $0x80] ss:$8 sps:$4 sm:$0xff]  }
 0x2ec   : > { %1816 = vmatprep.subr.bf16.mxu0 %v2570_v45  ;;  %v2603_v3 = vld [vmem:[#allocation11 + $0x180] ss:$8 sps:$4 sm:$0xff]   ;;  %v2604_v5 = vld [vmem:[#allocation11 + $0x94] ss:$8 sps:$4 sm:$0xff]   ;;  %v2608_v7 = vld [vmem:[#allocation11 + $0x90] ss:$8 sps:$4 sm:$0xff]  }
 0x2ed   : > { %v2606_v6 = vld [vmem:[#allocation11 + $0x194] ss:$8 sps:$4 sm:$0xff]   ;;  %v1328_v8 = vshrl.u32 %v1327_v4, 7  ;;  %v2609_v9 = vld [vmem:[#allocation11 + $0x190] ss:$8 sps:$4 sm:$0xff]  }
 0x2ee   : > { %1776 = vmatpush1.bf16.msra.mxu1 %v2572_v46  ;;  %v2610_v10 = vld [vmem:[#allocation11 + $0xa4] ss:$8 sps:$4 sm:$0xff]   ;;  %v2614_v12 = vld [vmem:[#allocation11 + $0xa0] ss:$8 sps:$4 sm:$0xff]   ;;  %v2616_v16 = vld [vmem:[#allocation11 + $0xb4] ss:$8 sps:$4 sm:$0xff]  }
 0x2ef   : > { %1817 = vmatpush1.bf16.msra.mxu0 %v2573_v47  ;;  %1777 = vmatprep.subr.bf16.mxu1 %v2574_v48  ;;  %v2612_v11 = vld [vmem:[#allocation11 + $0x1a4] ss:$8 sps:$4 sm:$0xff]   ;;  %v2615_v13 = vld [vmem:[#allocation11 + $0x1a0] ss:$8 sps:$4 sm:$0xff]   ;;  %v3108_v14 = vsub.s32 1, %v1328_v8  ;;  %v1341_v15 = vsub.s32 3, %v1328_v8 }
 0x2f0   : > { %1818 = vmatprep.subr.bf16.mxu0 %v2576_v49  ;;  %v2618_v17 = vld [vmem:[#allocation11 + $0x1b4] ss:$8 sps:$4 sm:$0xff]   ;;  %v3110_v18 = vsub.s32 0, %v1328_v8  ;;  %v1337_v19 = vsub.s32 2, %v1328_v8  ;;  %v2620_v20 = vld [vmem:[#allocation11 + $0xb0] ss:$8 sps:$4 sm:$0xff]  }
 0x2f1   : > { %v2621_v21 = vld [vmem:[#allocation11 + $0x1b0] ss:$8 sps:$4 sm:$0xff]   ;;  %v1351_v24 = vld [vmem:[#allocation3] sm:$0xf]  ;;  %v2622_v26 = vld [vmem:[#allocation11 + $0xc4] ss:$8 sps:$4 sm:$0xff]  }
 0x2f2   : > { %1778 = vmatpush1.bf16.msra.mxu1 %v2578_v50  ;;  %v1325_v22 = vld [vmem:[#allocation2] sm:$0xf]  ;;  %v1360_v27 = vrot.slane %v1351_v24, %v3108_v14  ;;  %v1368_v39 = vrot.slane %v1351_v24, %v1341_v15  ;;  %v2624_v28 = vld [vmem:[#allocation11 + $0x1c4] ss:$8 sps:$4 sm:$0xff]   ;;  %v2626_v31 = vld [vmem:[#allocation11 + $0xc0] ss:$8 sps:$4 sm:$0xff]  }
 0x2f3   : > { %1819 = vmatpush1.bf16.msra.mxu0 %v2579_v51  ;;  %1779 = vmatprep.subr.bf16.mxu1 %v2580_v53  ;;  %v1334_v23 = vrot.slane %v1325_v22, %v3108_v14  ;;  %v1342_v25 = vrot.slane %v1325_v22, %v1341_v15  ;;  %v1330_v35 = vrot.slane %v1325_v22, %v3110_v18  ;;  %v2627_v32 = vld [vmem:[#allocation11 + $0x1c0] ss:$8 sps:$4 sm:$0xff]   ;;  %v2628_v37 = vld [vmem:[#allocation11 + $0xd4] ss:$8 sps:$4 sm:$0xff]   ;;  %v2632_v46 = vld [vmem:[#allocation11 + $0xd0] ss:$8 sps:$4 sm:$0xff]  }
 0x2f4   : > { %1820 = vmatprep.subr.bf16.mxu0 %v2582_v54  ;;  %v1338_v36 = vrot.slane %v1325_v22, %v1337_v19  ;;  %v2630_v38 = vld [vmem:[#allocation11 + $0x1d4] ss:$8 sps:$4 sm:$0xff]   ;;  %v2633_v47 = vld [vmem:[#allocation11 + $0x1d0] ss:$8 sps:$4 sm:$0xff]   ;;  %v1364_v51 = vrot.slane %v1351_v24, %v1337_v19  ;;  %v2634_v53 = vld [vmem:[#allocation11 + $0xe4] ss:$8 sps:$4 sm:$0xff]  }
 0x2f5   : > { %v1348_v29 = vmul.f32 %v1334_v23, %v3070_v42  ;;  %v1350_v30 = vmul.f32 %v1342_v25, %v3072_v43  ;;  %v1347_v42 = vmul.f32 %v1330_v35, %v3066_v40  ;;  %v1356_v43 = vrot.slane %v1351_v24, %v3110_v18  ;;  %v2636_v54 = vld [vmem:[#allocation11 + $0x1e4] ss:$8 sps:$4 sm:$0xff]   ;;  %v2650_v4 = vld [vmem:[#allocation12 + $0x50] sm:$0xff]   ;;  %v2660_v15 = vld [vmem:[#allocation12 + $0x78] sm:$0xff]  }
 0x2f6   : > { %1780 = vmatpush1.bf16.msra.mxu1 %v2584_v55  ;;  %v1349_v50 = vmul.f32 %v1338_v36, %v3068_v41  ;;  %v2638_v55 = vld [vmem:[#allocation11 + $0xe0] ss:$8 sps:$4 sm:$0xff]   ;;  %v1865_v19 = vld [vmem:[#allocation5] sm:$0x3] }
 0x2f7   : > { %1821 = vmatpush1.bf16.msra.mxu0 %v2585_v56  ;;  %1781 = vmatprep.subr.bf16.mxu1 %v2586_v57  ;;  %v1374_v33 = vadd.f32 %v1360_v27, %v1348_v29  ;;  %v1376_v34 = vadd.f32 %v1368_v39, %v1350_v30  ;;  %v2639_v56 = vld [vmem:[#allocation11 + $0x1e0] ss:$8 sps:$4 sm:$0xff]   ;;  %v2640_v57 = vld [vmem:[#allocation11 + $0xf4] ss:$8 sps:$4 sm:$0xff]   ;;  %v1373_v40 = vadd.f32 %v1356_v43, %v1347_v42 }
 0x2f8   : > { %1822 = vmatprep.subr.bf16.mxu0 %v2588_v58  ;;  %v1375_v58 = vadd.f32 %v1364_v51, %v1349_v50  ;;  %v2654_v8 = vld [vmem:[#allocation12 + $0x60] sm:$0xff]   ;;  %v1870_v25 = vrot.slane %v1865_v19, %v3110_v18 }
 0x2f9   : > { %v1378_v44 = vmax.f32 %v1374_v33, 0.0  ;;  %v1380_v45 = vmax.f32 %v1376_v34, 0.0  ;;  %v1377_v41 = vmax.f32 %v1373_v40, 0.0 }
 0x2fa   : > { %1782 = vmatpush1.bf16.msra.mxu1 %v2590_v59  ;;  %v2642_v59 = vld [vmem:[#allocation11 + $0x1f4] ss:$8 sps:$4 sm:$0xff]  }
 0x2fb   : > { %1823 = vmatpush1.bf16.msra.mxu0 %v2591_v60  ;;  %1783 = vmatprep.subr.bf16.mxu1 %v2592_v61  ;;  %v1382_v48 = vpack.c.bf16 %v1378_v44, %v1378_v44  ;;  %v1384_v49 = vpack.c.bf16 %v1380_v45, %v1380_v45  ;;  %v1379_v60 = vmax.f32 %v1375_v58, 0.0  ;;  %v2644_v61 = vld [vmem:[#allocation11 + $0xf0] ss:$8 sps:$4 sm:$0xff]  }
 0x2fc   : > { %1824 = vmatprep.subr.bf16.mxu0 %v2594_v62  ;;  %v2645_v62 = vld [vmem:[#allocation11 + $0x1f0] ss:$8 sps:$4 sm:$0xff]  }
 0x2fd   : > { %1801 = vmatprep.mubr.bf16.mxu1 %v1382_v48  ;;  %1842 = vmatprep.mubr.bf16.mxu0 %v1384_v49 }
 0x2fe   : > { %1784 = vmatpush1.bf16.msra.mxu1 %v2596_v63  ;;  %v2646_v63 = vld [vmem:[#allocation12 + $0x40] sm:$0xff]  }
 0x2ff   : > { %1825 = vmatpush1.bf16.msra.mxu0 %v2597_v0  ;;  %1785 = vmatprep.subr.bf16.mxu1 %v2598_v1  ;;  %v1381_v0 = vpack.c.bf16 %v1377_v41, %v1377_v41  ;;  %v1383_v1 = vpack.c.bf16 %v1379_v60, %v1379_v60 }
 0x300   : > { %1826 = vmatprep.subr.bf16.mxu0 %v2600_v2  ;;  %v2647_v2 = vld [vmem:[#allocation12] sm:$0xff]  }
 0x302   : > { %1786 = vmatpush1.bf16.msra.mxu1 %v2602_v52  ;;  %v2648_v52 = vld [vmem:[#allocation12 + $0x48] sm:$0xff]  }
 0x303   : > { %1827 = vmatpush1.bf16.msra.mxu0 %v2603_v3  ;;  %1787 = vmatprep.subr.bf16.mxu1 %v2604_v5  ;;  %v2649_v3 = vld [vmem:[#allocation12 + $0x8] sm:$0xff]   ;;  %v2651_v5 = vld [vmem:[#allocation12 + $0x10] sm:$0xff]  }
 0x304   : > { %1828 = vmatprep.subr.bf16.mxu0 %v2606_v6  ;;  %v2652_v6 = vld [vmem:[#allocation12 + $0x58] sm:$0xff]  }
 0x306   : > { %1788 = vmatpush1.bf16.msra.mxu1 %v2608_v7  ;;  %v2653_v7 = vld [vmem:[#allocation12 + $0x18] sm:$0xff]  }
 0x307   : > { %1829 = vmatpush1.bf16.msra.mxu0 %v2609_v9  ;;  %1789 = vmatprep.subr.bf16.mxu1 %v2610_v10  ;;  %v2655_v9 = vld [vmem:[#allocation12 + $0x20] sm:$0xff]   ;;  %v2656_v10 = vld [vmem:[#allocation12 + $0x68] sm:$0xff]  }
 0x308   : > { %1830 = vmatprep.subr.bf16.mxu0 %v2612_v11  ;;  %v2657_v11 = vld [vmem:[#allocation12 + $0x28] sm:$0xff]  }
 0x30a   : > { %1790 = vmatpush1.bf16.msra.mxu1 %v2614_v12  ;;  %v2658_v12 = vld [vmem:[#allocation12 + $0x70] sm:$0xff]  }
 0x30b   : > { %1831 = vmatpush1.bf16.msra.mxu0 %v2615_v13  ;;  %1791 = vmatprep.subr.bf16.mxu1 %v2616_v16  ;;  %v2659_v13 = vld [vmem:[#allocation12 + $0x30] sm:$0xff]   ;;  %v2661_v16 = vld [vmem:[#allocation12 + $0x38] sm:$0xff]  }
 0x30c   : > { %1832 = vmatprep.subr.bf16.mxu0 %v2618_v17  ;;  %v1851_v17 = vld [vmem:[#allocation4] sm:$0x3] }
 0x30d   : > { %v1860_v23 = vrot.slane %v1851_v17, %v3108_v14 }
 0x30e   : > { %1792 = vmatpush1.bf16.msra.mxu1 %v2620_v20  ;;  %v1856_v20 = vrot.slane %v1851_v17, %v3110_v18 }
 0x30f   : > { %1833 = vmatpush1.bf16.msra.mxu0 %v2621_v21  ;;  %1793 = vmatprep.subr.bf16.mxu1 %v2622_v26 }
 0x310   : > { %1834 = vmatprep.subr.bf16.mxu0 %v2624_v28  ;;  %v1874_v28 = vrot.slane %v1865_v19, %v3108_v14 }
 0x312   : > { %1794 = vmatpush1.bf16.msra.mxu1 %v2626_v31 }
 0x313   : > { %1835 = vmatpush1.bf16.msra.mxu0 %v2627_v32  ;;  %1795 = vmatprep.subr.bf16.mxu1 %v2628_v37 }
 0x314   : > { %1836 = vmatprep.subr.bf16.mxu0 %v2630_v38 }
 0x316   : > { %1796 = vmatpush1.bf16.msra.mxu1 %v2632_v46  ;;  %v2304_v46 = vld [vmem:[%s3172_s8] ss:$0 sm:$0xff] }
 0x317   : > { %1837 = vmatpush1.bf16.msra.mxu0 %v2633_v47  ;;  %1797 = vmatprep.subr.bf16.mxu1 %v2634_v53 }
 0x318   : > { %1838 = vmatprep.subr.bf16.mxu0 %v2636_v54 }
 0x31a   : > { %1798 = vmatpush1.bf16.msra.mxu1 %v2638_v55 }
 0x31b   : > { %1839 = vmatpush1.bf16.msra.mxu0 %v2639_v56  ;;  %1799 = vmatprep.subr.bf16.mxu1 %v2640_v57 }
 0x31c   : > { %1840 = vmatprep.subr.bf16.mxu0 %v2642_v59 }
 0x31e   : > { %1800 = vmatpush1.bf16.msra.mxu1 %v2644_v61 }
 0x31f   : > { %1841 = vmatpush1.bf16.msra.mxu0 %v2645_v62  ;;  %2328 = vmatprep.subr.bf16.mxu1 %v2646_v63 }
 0x321   : > { %1802 = vmatmul.mubr.bf16.vlgmr.msra.gmra.mrb[0].mxu1 %v1381_v0 }
 0x322   : > { %1843 = vmatmul.mubr.bf16.vlgmr.msra.gmra.mrb[0].mxu0 %v1383_v1  ;;  %2329 = vmatpush3.bf16.msra.mxu1 %v2647_v2 }
 0x323   : > { %2330 = vmatprep.subr.bf16.mxu1 %v2648_v52 }
 0x326   : > { %2331 = vmatpush3.bf16.msra.mxu1 %v2649_v3 }
 0x327   : > { %2332 = vmatprep.subr.bf16.mxu1 %v2650_v4 }
 0x32a   : > { %2333 = vmatpush3.bf16.msra.mxu1 %v2651_v5 }
 0x32b   : > { %2334 = vmatprep.subr.bf16.mxu1 %v2652_v6 }
 0x32e   : > { %2335 = vmatpush3.bf16.msra.mxu1 %v2653_v7 }
 0x32f   : > { %2336 = vmatprep.subr.bf16.mxu1 %v2654_v8 }
 0x332   : > { %2337 = vmatpush3.bf16.msra.mxu1 %v2655_v9 }
 0x333   : > { %2338 = vmatprep.subr.bf16.mxu1 %v2656_v10 }
 0x336   : > { %2339 = vmatpush3.bf16.msra.mxu1 %v2657_v11 }
 0x337   : > { %2340 = vmatprep.subr.bf16.mxu1 %v2658_v12 }
 0x33a   : > { %2341 = vmatpush3.bf16.msra.mxu1 %v2659_v13 }
 0x33b   : > { %2342 = vmatprep.subr.bf16.mxu1 %v2660_v15 }
 0x33e   : > { %2343 = vmatpush3.bf16.msra.mxu1 %v2661_v16 }
 0x3f4   : > { %v1803_v21 = vpop.f32.mrb[0].mxu1 }
 0x3f5   : > { %v1844_v22 = vpop.f32.mrb[0].mxu0  ;;  %v1805_v26 = vpop.f32.mrb[1].mxu1 }
 0x3f6   : > { %v1845_v24 = vadd.f32 %v1844_v22, %v1803_v21  ;;  %v1846_v27 = vpop.f32.mrb[1].mxu0  ;;  %v1807_v29 = vpop.f32.mrb[2].mxu1 }
 0x3f7   : > { %v1847_v39 = vadd.f32 %v1846_v27, %v1805_v26  ;;  %v1848_v30 = vpop.f32.mrb[2].mxu0  ;;  %v1808_v35 = vpop.f32.mrb[3].mxu1 }
 0x3f8   : > { %v1863_v31 = vmul.f32 %v1856_v20, %v1845_v24  ;;  %v1849_v32 = vpop.f32.mrb[3].mxu0 }
 0x3f9   : > { %v1864_v33 = vmul.f32 %v1860_v23, %v1847_v39 }
 0x3fa   : > { %v1877_v34 = vadd.f32 %v1870_v25, %v1863_v31 }
 0x3fb   : > { %v1878_v36 = vadd.f32 %v1874_v28, %v1864_v33 }
 0x3fc   : > { %v1879_v37 = vmax.f32 %v1877_v34, 0.0 }
 0x3fd   : > { %v1880_v38 = vmax.f32 %v1878_v36, 0.0 }
 0x3fe   : > { %v1881_v45 = vpack.c.bf16 %v1879_v37, %v1879_v37 }
 0x3ff   : > { %v1882_v44 = vpack.c.bf16 %v1880_v38, %v1880_v38 }
 0x401   : > { %2050 = vmatprep.mubr.bf16.mxu1 %v1882_v44 }
 0x402   : > { %2051 = vmatmul.mubr.bf16.vlgmr.msra.gmra.mrb[4].mxu1 %v1881_v45 }
 0x4d5   : > { %v2344_v18 = vpop.f32.mrb[4].mxu1 }
 0x4d6   : > { %v2345_v14 = vpop.f32.mrb[5].mxu1 }
 0x4d7   : > { %v2346_v42 = vadd.f32 %v2345_v14, %v2344_v18  ;;  %v2347_v43 = vpop.f32.mrb[6].mxu1 }
 0x4d8   : > { %v2348_v47 = vpop.f32.mrb[7].mxu1 }
 0x4d9   : > { %v2053_v48 = vadd.f32 %v2346_v42, %v2304_v46 }
 0x4db   : > { %2058 = vst [vmem:[#allocation14] sm:$0xff] %v2053_v48 }
 0x4dc PF: > { %s3187_s26 = sadd.s32 4294967295, %s2838_s11   ;;  %s2856_s29 = smov [#allocation14]  }
 0x4dd   : > { %p3129_p6 = scmp.eq.s32.totalorder %s3187_s26, 2  ;;  %s2068_s21 = sshll.u32 %s2856_s29, 4  ;;  %s2069_s21 = int_to_ptr.vmem [resolvable:$true] %s2068_s21 }
 0x4de   : > { %s2774_s14 = scalar_lea.vmem %s2069_s21, 128  ;;  %p2781_p7 = scmp.lt.s32.totalorder %s2069_s21, %s2069_s21 }
 0x4df   : > { %p2775_p0 = scmp.ne.s32.totalorder %s2069_s21, %s2774_s14  ;;  %p2782_p9 = scmp.lt.s32.totalorder %s2774_s14, %s2774_s14 }
 0x4e1   : > { %p2776_p1 = pnand %p2775_p0, %p3129_p6  ;;  %p2783_p2 = por %p2782_p9, %p2781_p7 }
 0x4e3   : > { %p2777_p4 = pneg %p2776_p1 }
 0x4e5   : > { %p2784_p3 = pnand %p2783_p2, %p2777_p4 }
 0x4e7   : > { %2787 = shalt.err (!%p2784_p3)
}
 0x4e8   : > { %s2788_s19 = scalar_lea.hbm %s3173_s9, 128 }
 0x4e9   : > { %p2789_p5 = scmp.ne.s32.totalorder %s3173_s9, %s2788_s19  ;;  %p2794_p11 = scmp.lt.u32.totalorder %s2788_s19, %s3173_s9 }
 0x4eb   : > { %p2790_p8 = pnand %p2789_p5, %p3129_p6 }
 0x4ed   : > { %p2791_p10 = pneg %p2790_p8 }
 0x4ef   : > { %p2796_p12 = pnand %p2794_p11, %p2791_p10 }
 0x4f1   : > { %2799 = shalt.err (!%p2796_p12)
}
 0x4f2   : > { %2371 = dma.vmem_to_hbm [thread:$0]  (%p3129_p6), %s2069_s21, 128, %s3173_s9, [#allocation8]  }
 0x4f3   : > { %2825 = dma.done.wait (%p3129_p6), [#allocation8], 128  }
 0x4f4   : > { %2827 = vsyncadd (%p3129_p6), [#allocation8], 4294967168 }
 0x4f5 PF: > { %s23_s11 = sadd.s32 1, %s2838_s11   ;;  %s3189_s30 = sld [smem:[#allocation19_spill]] }
 0x4f6   : > { %p20_p13 = scmp.ge.s32.totalorder %s23_s11, 5   ;;  %s3190_s10 = smov %s3192_s18 }
 0x4f8   :  { %22 = sbr.rel (!%p20_p13) target bundleno = 5 (0x5), region = 123 }
 0x4ff   :  { %2081 = vsyncpa [#allocation7], 1 }
 0x500   :  { %2083 = vsyncpa [#allocation7 + $0x1], 1 }
 0x501   :  { %2084 = vsyncpa [#allocation10], 1 }
 0x502   :  { %2085 = vsyncpa [#allocation13], 1 }
 0x503   :  { %2086 = vsyncpa [#allocation8], 1 }
 0x504   :  { %2088 = vsyncpa [#allocation8 + $0x1], 1 }

</bundles_post_ra>
